<compile_context>
chip_gen: v5e
topology: v5e:2x2
jax: 0.10.0
libtpu: 0.0.40
codegen_flags: <defaults>
</compile_context>

<pallas_src>
import jax
import jax.numpy as jnp
import numpy as np
from jax.experimental import pallas as pl
from jax.experimental.pallas import tpu as pltpu

# ----- config (mirrors the MyLLMConfigForMoE fields the module uses) -----
BSZ, SEQ, HIDDEN = 2, 8, 32
NUM_EXPERTS = 4
NUM_SHARE = 1
INTERMEDIATE = 64
EXPERT_SIZE = INTERMEDIATE // NUM_EXPERTS            # 16
NUM_ROUTED = NUM_EXPERTS - NUM_SHARE                 # 3 routed experts
TOPK = NUM_ROUTED                                    # config.topk_experts = n
ROUTED_WIDTH = NUM_ROUTED * EXPERT_SIZE              # 48
SHARE_WIDTH = NUM_SHARE * EXPERT_SIZE                # 16


def _moe_kernel(x_ref,
                wr_ref, br_ref,
                wup_ref, bup_ref, wsw_ref, bsw_ref, wdn_ref, bdn_ref, expand_ref,
                wsu_ref, bsu_ref, wssw_ref, bssw_ref, wsd_ref, bsd_ref,
                out_ref):
    x = x_ref[...]                                   # (TN, H) f32
    x_bf = x.astype(jnp.bfloat16)                    # GEMM operand (v6e/v7x bf16 MXU)

    # ---------- router (f32): gate -> top-k (lower index wins ties) -> masked softmax
    gate = jnp.dot(x, wr_ref[...], preferred_element_type=jnp.float32) + br_ref[...]
    e_idx = jax.lax.broadcasted_iota(jnp.int32, gate.shape, 1)
    work = gate
    selected = jnp.zeros(gate.shape, dtype=jnp.bool_)
    for _ in range(TOPK):                            # TOPK max-extract passes (not E^2 rank loop)
        is_max = work == jnp.max(work, axis=-1, keepdims=True)
        pick_idx = jnp.min(jnp.where(is_max, e_idx, NUM_EXPERTS), axis=-1, keepdims=True)
        pick = e_idx == pick_idx                     # lowest index among maxima -> torch.topk ties
        selected = selected | pick
        work = jnp.where(pick, -jnp.inf, work)
    row_max = jnp.max(gate, axis=-1, keepdims=True)          # row max is always selected
    p = jnp.where(selected, jnp.exp(gate - row_max), 0.0)    # exact 0 when unselected
    w_all = p * pl.reciprocal(jnp.sum(p, axis=-1, keepdims=True), approx=True)
    w_routed = w_all[:, :NUM_ROUTED]                          # (TN, NR) f32

    # ---------- routed experts: fused up GEMM -> per-expert SwiGLU -> fused down GEMM
    h = jnp.dot(x_bf, wup_ref[...], preferred_element_type=jnp.float32) + bup_ref[...]  # (TN, NR*ES) f32
    wsw = wsw_ref[...]                               # (NR, ES, ES) bf16 (stacked, not block-diag)
    bsw = bsw_ref[...]                               # (NR, ES) f32
    a_parts = []
    for e in range(NUM_ROUTED):
        he = h[:, e * EXPERT_SIZE:(e + 1) * EXPERT_SIZE]
        ge = jnp.dot(he.astype(jnp.bfloat16), wsw[e],
                     preferred_element_type=jnp.float32) + bsw[e:e + 1, :]
        a_parts.append(he * (ge * jax.nn.sigmoid(ge)))        # SwiGLU in f32 (VPU/EUP)
    a = jnp.concatenate(a_parts, axis=-1)                     # (TN, NR*ES) f32
    # routing weight broadcast onto each expert's lane slice via a tiny MXU op
    w_lanes = jnp.dot(w_routed, expand_ref[...], preferred_element_type=jnp.float32)
    scaled = (a * w_lanes).astype(jnp.bfloat16)               # exact 0 slices for unrouted experts
    routed = jnp.dot(scaled, wdn_ref[...], preferred_element_type=jnp.float32)
    routed = routed + jnp.dot(w_routed, bdn_ref[...],
                              preferred_element_type=jnp.float32)  # weighted per-expert down bias

    # ---------- shared experts: share_up -> per-chunk SwiGLU -> share_down
    hs = jnp.dot(x_bf, wsu_ref[...], preferred_element_type=jnp.float32) + bsu_ref[...]
    wssw = wssw_ref[...]                              # (ES, ES) bf16 (same module for every chunk)
    sh_parts = []
    for s in range(NUM_SHARE):
        hss = hs[:, s * EXPERT_SIZE:(s + 1) * EXPERT_SIZE]
        gss = jnp.dot(hss.astype(jnp.bfloat16), wssw,
                      preferred_element_type=jnp.float32) + bssw_ref[...]
        sh_parts.append(hss * (gss * jax.nn.sigmoid(gss)))
    a_sh = sh_parts[0] if NUM_SHARE == 1 else jnp.concatenate(sh_parts, axis=-1)
    shared = jnp.dot(a_sh.astype(jnp.bfloat16), wsd_ref[...],
                     preferred_element_type=jnp.float32) + bsd_ref[...]

    out_ref[...] = (routed + shared).astype(out_ref.dtype)


def _make_moe_call(N, H, token_tile, single_buffer_weights):
    def wspec(shape):
        nd = len(shape)
        idx = lambda i, _nd=nd: (0,) * _nd
        if single_buffer_weights:
            # grid-invariant weights: keep one resident copy (no double-buffering)
            return pl.BlockSpec(shape, idx, pipeline_mode=pl.Buffered(1))
        return pl.BlockSpec(shape, idx)

    in_specs = [
        pl.BlockSpec((token_tile, H), lambda i: (i, 0)),               # x (tiled over tokens)
        wspec((H, NUM_EXPERTS)), wspec((1, NUM_EXPERTS)),              # router
        wspec((H, ROUTED_WIDTH)), wspec((1, ROUTED_WIDTH)),            # fused expert up
        wspec((NUM_ROUTED, EXPERT_SIZE, EXPERT_SIZE)),                 # stacked expert SwiGLU W
        wspec((NUM_ROUTED, EXPERT_SIZE)),                              # stacked expert SwiGLU b
        wspec((ROUTED_WIDTH, H)), wspec((NUM_ROUTED, H)),              # fused expert down (+ per-expert bias)
        wspec((NUM_ROUTED, ROUTED_WIDTH)),                             # 0/1 routing-weight expansion
        wspec((H, SHARE_WIDTH)), wspec((1, SHARE_WIDTH)),              # share_up
        wspec((EXPERT_SIZE, EXPERT_SIZE)), wspec((1, EXPERT_SIZE)),    # shared SwiGLU
        wspec((SHARE_WIDTH, H)), wspec((1, H)),                        # share_down
    ]
    out_spec = pl.BlockSpec((token_tile, H), lambda i: (i, 0))

    return pl.pallas_call(
        _moe_kernel,
        out_shape=jax.ShapeDtypeStruct((N, H), jnp.float32),
        grid_spec=pltpu.PrefetchScalarGridSpec(
            num_scalar_prefetch=0,
            grid=(N // token_tile,),
            in_specs=in_specs,
            out_specs=out_spec),
        compiler_params=pltpu.CompilerParams(
            dimension_semantics=("parallel",),
            # sized against v7x's 64 MiB/TC VMEM with headroom (also fine on v5e/v6e)
            vmem_limit_bytes=48 * 1024 * 1024),
    )


def _pick_token_tile(N):
    # >=2 grid steps (feeds v7x's second TensorCore and pipelines x/out DMA);
    # at production sizes sweep 256-1024 rows/step, re-derived for v7x VMEM.
    if N <= 8 or N % 8 != 0:
        return N
    tile = max(8, min(512, (N // 2) // 8 * 8))
    while tile > 8 and N % tile:
        tile -= 8
    return tile if N % tile == 0 else N


def fuse_params(p):
    """Pre-fuse per-expert weights into wide bf16 GEMM operands + small f32 routing mats."""
    nr, ns, es = NUM_ROUTED, NUM_SHARE, EXPERT_SIZE
    bf = jnp.bfloat16
    fp = {}
    # router stays f32 so top-k selection matches the fp32 reference exactly
    fp["wr"], fp["br"] = p["wr"], p["br"]
    # routed experts
    fp["wup"] = jnp.concatenate([p["wup"][e] for e in range(nr)], axis=1).astype(bf)   # (H, NR*ES)
    fp["bup"] = jnp.concatenate([p["bup"][e] for e in range(nr)], axis=1)              # (1, NR*ES) f32
    fp["wsw"] = p["wsw"].astype(bf)                                                    # (NR, ES, ES)
    fp["bsw"] = p["bsw"].reshape(nr, es)                                               # (NR, ES) f32
    fp["wdn"] = jnp.concatenate([p["wdn"][e] for e in range(nr)], axis=0).astype(bf)   # (NR*ES, H)
    fp["bdn"] = p["bdn"].reshape(nr, HIDDEN)                                           # (NR, H) f32
    expand = np.zeros((nr, nr * es), np.float32)                                       # routing weight -> lanes
    for e in range(nr):
        expand[e, e * es:(e + 1) * es] = 1.0
    fp["expand"] = jnp.asarray(expand)
    # shared experts
    fp["wsu"], fp["bsu"] = p["wsu"].astype(bf), p["bsu"]
    fp["wssw"], fp["bssw"] = p["wssw"].astype(bf), p["bssw"]
    fp["wsd"], fp["bsd"] = p["wsd"].astype(bf), p["bsd"]
    return fp


def moe_forward(x, params):
    B, S_, H = x.shape
    N = B * S_
    xf = x.reshape(N, H).astype(jnp.float32)
    fp = fuse_params(params)
    token_tile = _pick_token_tile(N)
    args = (xf,
            fp["wr"], fp["br"],
            fp["wup"], fp["bup"], fp["wsw"], fp["bsw"], fp["wdn"], fp["bdn"], fp["expand"],
            fp["wsu"], fp["bsu"], fp["wssw"], fp["bssw"], fp["wsd"], fp["bsd"])
    try:
        out = jax.block_until_ready(
            _make_moe_call(N, H, token_tile, single_buffer_weights=True)(*args))
    except Exception:
        # TODO(synk): pipeline_mode=pl.Buffered(1) not supported on this jax build;
        # fall back to default double-buffered weight specs.
        out = _make_moe_call(N, H, token_tile, single_buffer_weights=False)(*args)
    return out.reshape(B, S_, H)


# ---------------- pure-JAX reference (mirrors the PyTorch math, fp32) ----------------
def moe_reference(x, params):
    B, S_, H = x.shape
    N = B * S_
    xf = x.reshape(N, H).astype(jnp.float32)
    gate = xf @ params["wr"] + params["br"]
    ids = jnp.argsort(-gate, axis=-1)[:, :TOPK]              # stable -> lower index wins ties
    rows = jnp.arange(N)[:, None]
    sel = jnp.zeros_like(gate, dtype=bool).at[rows, ids].set(True)
    masked = jnp.where(sel, gate, -jnp.inf)
    logits = jax.nn.softmax(masked, axis=-1)
    acc = jnp.zeros_like(xf)
    for e in range(NUM_ROUTED):
        routed = jnp.any(ids == e, axis=-1, keepdims=True)
        h = xf @ params["wup"][e] + params["bup"][e]
        g = h @ params["wsw"][e] + params["bsw"][e]
        a = h * jax.nn.silu(g)
        y = a @ params["wdn"][e] + params["bdn"][e]
        acc = acc + jnp.where(routed, logits[:, e:e + 1] * y, 0.0)
    hs = xf @ params["wsu"] + params["bsu"]
    chunks = []
    for s in range(NUM_SHARE):
        hss = hs[:, s * EXPERT_SIZE:(s + 1) * EXPERT_SIZE]
        gss = hss @ params["wssw"] + params["bssw"]
        chunks.append(hss * jax.nn.silu(gss))
    a_sh = jnp.concatenate(chunks, axis=-1)
    share = a_sh @ params["wsd"] + params["bsd"]
    return (acc + share).reshape(B, S_, H)


# ---------------- deterministic parameter init ----------------
def init_params(key):
    def lin(k, fan_in, fan_out):
        k1, k2 = jax.random.split(k)
        w = jax.random.normal(k1, (fan_in, fan_out), jnp.float32) * 0.1
        b = jax.random.normal(k2, (1, fan_out), jnp.float32) * 0.1
        return w, b

    keys = jax.random.split(key, 5)
    p = {}
    p["wr"], p["br"] = lin(keys[0], HIDDEN, NUM_EXPERTS)

    ekeys = jax.random.split(keys[1], NUM_ROUTED * 3)
    wup, bup, wsw, bsw, wdn, bdn = [], [], [], [], [], []
    for e in range(NUM_ROUTED):
        w, b = lin(ekeys[3 * e + 0], HIDDEN, EXPERT_SIZE); wup.append(w); bup.append(b)
        w, b = lin(ekeys[3 * e + 1], EXPERT_SIZE, EXPERT_SIZE); wsw.append(w); bsw.append(b)
        w, b = lin(ekeys[3 * e + 2], EXPERT_SIZE, HIDDEN); wdn.append(w); bdn.append(b)
    p["wup"], p["bup"] = jnp.stack(wup), jnp.stack(bup)
    p["wsw"], p["bsw"] = jnp.stack(wsw), jnp.stack(bsw)
    p["wdn"], p["bdn"] = jnp.stack(wdn), jnp.stack(bdn)

    p["wsu"], p["bsu"] = lin(keys[2], HIDDEN, SHARE_WIDTH)
    p["wssw"], p["bssw"] = lin(keys[3], EXPERT_SIZE, EXPERT_SIZE)
    p["wsd"], p["bsd"] = lin(keys[4], SHARE_WIDTH, HIDDEN)
    return p


if __name__ == "__main__":
    key = jax.random.PRNGKey(0)
    kx, kp = jax.random.split(key)
    x = jax.random.normal(kx, (BSZ, SEQ, HIDDEN), jnp.float32)
    params = init_params(kp)

    out = jax.block_until_ready(moe_forward(x, params))

    ref = moe_reference(x, params)
    assert out.shape == (BSZ, SEQ, HIDDEN)
    # bf16 MXU operands on the expert/shared paths -> compare at bf16-level tolerance;
    # routing (top-k selection, exact-zero weights) still matches the fp32 reference.
    np.testing.assert_allclose(np.asarray(out), np.asarray(ref), rtol=2e-2, atol=2e-2)
    print("KERNEL_OK")
</pallas_src>

<mosaic_0001>
module attributes {stable_mosaic.version = 11 : i64} {
  func.func @_moe_kernel(%arg0: i32, %arg1: memref<8x32xf32, #tpu.memory_space<vmem>>, %arg2: memref<32x4xf32, #tpu.memory_space<vmem>>, %arg3: memref<1x4xf32, #tpu.memory_space<vmem>>, %arg4: memref<32x48xbf16, #tpu.memory_space<vmem>>, %arg5: memref<1x48xf32, #tpu.memory_space<vmem>>, %arg6: memref<3x16x16xbf16, #tpu.memory_space<vmem>>, %arg7: memref<3x16xf32, #tpu.memory_space<vmem>>, %arg8: memref<48x32xbf16, #tpu.memory_space<vmem>>, %arg9: memref<3x32xf32, #tpu.memory_space<vmem>>, %arg10: memref<3x48xf32, #tpu.memory_space<vmem>>, %arg11: memref<32x16xbf16, #tpu.memory_space<vmem>>, %arg12: memref<1x16xf32, #tpu.memory_space<vmem>>, %arg13: memref<16x16xbf16, #tpu.memory_space<vmem>>, %arg14: memref<1x16xf32, #tpu.memory_space<vmem>>, %arg15: memref<16x32xbf16, #tpu.memory_space<vmem>>, %arg16: memref<1x32xf32, #tpu.memory_space<vmem>>, %arg17: memref<8x32xf32, #tpu.memory_space<vmem>>) attributes {dimension_semantics = [#tpu.dimension_semantics<parallel>], iteration_bounds = array<i64: 2>, scalar_prefetch = 0 : i64, scratch_operands = 0 : i64, tpu.core_type = #tpu.core_type<tc>, window_params = [{transform_indices = @transform_0, window_bounds = array<i64: 8, 32>}, {pipeline_mode = #tpu.pipeline_mode<synchronous>, transform_indices = @transform_1, window_bounds = array<i64: 32, 4>}, {pipeline_mode = #tpu.pipeline_mode<synchronous>, transform_indices = @transform_2, window_bounds = array<i64: 1, 4>}, {pipeline_mode = #tpu.pipeline_mode<synchronous>, transform_indices = @transform_3, window_bounds = array<i64: 32, 48>}, {pipeline_mode = #tpu.pipeline_mode<synchronous>, transform_indices = @transform_4, window_bounds = array<i64: 1, 48>}, {pipeline_mode = #tpu.pipeline_mode<synchronous>, transform_indices = @transform_5, window_bounds = array<i64: 3, 16, 16>}, {pipeline_mode = #tpu.pipeline_mode<synchronous>, transform_indices = @transform_6, window_bounds = array<i64: 3, 16>}, {pipeline_mode = #tpu.pipeline_mode<synchronous>, transform_indices = @transform_7, window_bounds = array<i64: 48, 32>}, {pipeline_mode = #tpu.pipeline_mode<synchronous>, transform_indices = @transform_8, window_bounds = array<i64: 3, 32>}, {pipeline_mode = #tpu.pipeline_mode<synchronous>, transform_indices = @transform_9, window_bounds = array<i64: 3, 48>}, {pipeline_mode = #tpu.pipeline_mode<synchronous>, transform_indices = @transform_10, window_bounds = array<i64: 32, 16>}, {pipeline_mode = #tpu.pipeline_mode<synchronous>, transform_indices = @transform_11, window_bounds = array<i64: 1, 16>}, {pipeline_mode = #tpu.pipeline_mode<synchronous>, transform_indices = @transform_12, window_bounds = array<i64: 16, 16>}, {pipeline_mode = #tpu.pipeline_mode<synchronous>, transform_indices = @transform_13, window_bounds = array<i64: 1, 16>}, {pipeline_mode = #tpu.pipeline_mode<synchronous>, transform_indices = @transform_14, window_bounds = array<i64: 16, 32>}, {pipeline_mode = #tpu.pipeline_mode<synchronous>, transform_indices = @transform_15, window_bounds = array<i64: 1, 32>}, {transform_indices = @transform_16, window_bounds = array<i64: 8, 32>}]} {
    %c0 = arith.constant 0 : index
    %c0_0 = arith.constant 0 : index
    %0 = vector.load %arg1[%c0, %c0_0] : memref<8x32xf32, #tpu.memory_space<vmem>>, vector<8x32xf32>
    %1 = arith.truncf %0 : vector<8x32xf32> to vector<8x32xbf16>
    %c0_1 = arith.constant 0 : index
    %c0_2 = arith.constant 0 : index
    %2 = vector.load %arg2[%c0_1, %c0_2] : memref<32x4xf32, #tpu.memory_space<vmem>>, vector<32x4xf32>
    %cst = arith.constant dense<0.000000e+00> : vector<8x4xf32>
    %3 = tpu.matmul %0, %2, %cst {dimension_numbers = #tpu.dot_dimension_numbers<[1], [0], [0], [1], [0, 0, 1, 1], [], []>} : vector<8x32xf32>, vector<32x4xf32>, vector<8x4xf32> -> vector<8x4xf32>
    %c0_3 = arith.constant 0 : index
    %c0_4 = arith.constant 0 : index
    %4 = vector.load %arg3[%c0_3, %c0_4] : memref<1x4xf32, #tpu.memory_space<vmem>>, vector<1x4xf32>
    %5 = vector.broadcast %4 : vector<1x4xf32> to vector<8x4xf32>
    %6 = arith.addf %3, %5 : vector<8x4xf32>
    %7 = tpu.iota {dimensions = array<i32: 1>} : vector<8x4xi32>
    %false = arith.constant false
    %8 = vector.broadcast %false : i1 to vector<8x4xi1>
    %cst_5 = arith.constant dense<0xFF800000> : vector<8xf32>
    %9 = vector.multi_reduction <maximumf>, %6, %cst_5 [1] : vector<8x4xf32> to vector<8xf32>
    %10 = vector.shape_cast %9 : vector<8xf32> to vector<8x1xf32>
    %11 = vector.broadcast %10 : vector<8x1xf32> to vector<8x4xf32>
    %12 = arith.cmpf oeq, %6, %11 : vector<8x4xf32>
    %c4_i32 = arith.constant 4 : i32
    %13 = vector.broadcast %c4_i32 : i32 to vector<8x4xi32>
    %14 = arith.select %12, %7, %13 : vector<8x4xi1>, vector<8x4xi32>
    %cst_6 = arith.constant dense<2147483647> : vector<8xi32>
    %15 = vector.multi_reduction <minsi>, %14, %cst_6 [1] : vector<8x4xi32> to vector<8xi32>
    %16 = vector.shape_cast %15 : vector<8xi32> to vector<8x1xi32>
    %17 = vector.broadcast %16 : vector<8x1xi32> to vector<8x4xi32>
    %18 = arith.cmpi eq, %7, %17 : vector<8x4xi32>
    %19 = arith.ori %8, %18 : vector<8x4xi1>
    %cst_7 = arith.constant 0xFF800000 : f32
    %20 = vector.broadcast %cst_7 : f32 to vector<8x4xf32>
    %21 = arith.select %18, %20, %6 : vector<8x4xi1>, vector<8x4xf32>
    %cst_8 = arith.constant dense<0xFF800000> : vector<8xf32>
    %22 = vector.multi_reduction <maximumf>, %21, %cst_8 [1] : vector<8x4xf32> to vector<8xf32>
    %23 = vector.shape_cast %22 : vector<8xf32> to vector<8x1xf32>
    %24 = vector.broadcast %23 : vector<8x1xf32> to vector<8x4xf32>
    %25 = arith.cmpf oeq, %21, %24 : vector<8x4xf32>
    %c4_i32_9 = arith.constant 4 : i32
    %26 = vector.broadcast %c4_i32_9 : i32 to vector<8x4xi32>
    %27 = arith.select %25, %7, %26 : vector<8x4xi1>, vector<8x4xi32>
    %cst_10 = arith.constant dense<2147483647> : vector<8xi32>
    %28 = vector.multi_reduction <minsi>, %27, %cst_10 [1] : vector<8x4xi32> to vector<8xi32>
    %29 = vector.shape_cast %28 : vector<8xi32> to vector<8x1xi32>
    %30 = vector.broadcast %29 : vector<8x1xi32> to vector<8x4xi32>
    %31 = arith.cmpi eq, %7, %30 : vector<8x4xi32>
    %32 = arith.ori %19, %31 : vector<8x4xi1>
    %cst_11 = arith.constant 0xFF800000 : f32
    %33 = vector.broadcast %cst_11 : f32 to vector<8x4xf32>
    %34 = arith.select %31, %33, %21 : vector<8x4xi1>, vector<8x4xf32>
    %cst_12 = arith.constant dense<0xFF800000> : vector<8xf32>
    %35 = vector.multi_reduction <maximumf>, %34, %cst_12 [1] : vector<8x4xf32> to vector<8xf32>
    %36 = vector.shape_cast %35 : vector<8xf32> to vector<8x1xf32>
    %37 = vector.broadcast %36 : vector<8x1xf32> to vector<8x4xf32>
    %38 = arith.cmpf oeq, %34, %37 : vector<8x4xf32>
    %c4_i32_13 = arith.constant 4 : i32
    %39 = vector.broadcast %c4_i32_13 : i32 to vector<8x4xi32>
    %40 = arith.select %38, %7, %39 : vector<8x4xi1>, vector<8x4xi32>
    %cst_14 = arith.constant dense<2147483647> : vector<8xi32>
    %41 = vector.multi_reduction <minsi>, %40, %cst_14 [1] : vector<8x4xi32> to vector<8xi32>
    %42 = vector.shape_cast %41 : vector<8xi32> to vector<8x1xi32>
    %43 = vector.broadcast %42 : vector<8x1xi32> to vector<8x4xi32>
    %44 = arith.cmpi eq, %7, %43 : vector<8x4xi32>
    %45 = arith.ori %32, %44 : vector<8x4xi1>
    %cst_15 = arith.constant dense<0xFF800000> : vector<8xf32>
    %46 = vector.multi_reduction <maximumf>, %6, %cst_15 [1] : vector<8x4xf32> to vector<8xf32>
    %47 = vector.shape_cast %46 : vector<8xf32> to vector<8x1xf32>
    %48 = vector.broadcast %47 : vector<8x1xf32> to vector<8x4xf32>
    %49 = arith.subf %6, %48 : vector<8x4xf32>
    %50 = math.exp %49 : vector<8x4xf32>
    %cst_16 = arith.constant 0.000000e+00 : f32
    %51 = vector.broadcast %cst_16 : f32 to vector<8x4xf32>
    %52 = arith.select %45, %50, %51 : vector<8x4xi1>, vector<8x4xf32>
    %cst_17 = arith.constant dense<0.000000e+00> : vector<8xf32>
    %53 = vector.multi_reduction <add>, %52, %cst_17 [1] : vector<8x4xf32> to vector<8xf32>
    %54 = vector.shape_cast %53 : vector<8xf32> to vector<8x1xf32>
    %55 = tpu.reciprocal %54 {approx = true} : vector<8x1xf32> -> vector<8x1xf32>
    %56 = vector.broadcast %55 : vector<8x1xf32> to vector<8x4xf32>
    %57 = arith.mulf %52, %56 : vector<8x4xf32>
    %58 = vector.extract_strided_slice %57 {offsets = [0, 0], sizes = [8, 3], strides = [1, 1]} : vector<8x4xf32> to vector<8x3xf32>
    %c0_18 = arith.constant 0 : index
    %c0_19 = arith.constant 0 : index
    %59 = vector.load %arg4[%c0_18, %c0_19] : memref<32x48xbf16, #tpu.memory_space<vmem>>, vector<32x48xbf16>
    %cst_20 = arith.constant dense<0.000000e+00> : vector<8x48xf32>
    %60 = tpu.matmul %1, %59, %cst_20 {dimension_numbers = #tpu.dot_dimension_numbers<[1], [0], [0], [1], [0, 0, 1, 1], [], []>} : vector<8x32xbf16>, vector<32x48xbf16>, vector<8x48xf32> -> vector<8x48xf32>
    %c0_21 = arith.constant 0 : index
    %c0_22 = arith.constant 0 : index
    %61 = vector.load %arg5[%c0_21, %c0_22] : memref<1x48xf32, #tpu.memory_space<vmem>>, vector<1x48xf32>
    %62 = vector.broadcast %61 : vector<1x48xf32> to vector<8x48xf32>
    %63 = arith.addf %60, %62 : vector<8x48xf32>
    %c0_23 = arith.constant 0 : index
    %c0_24 = arith.constant 0 : index
    %c0_25 = arith.constant 0 : index
    %64 = vector.load %arg6[%c0_23, %c0_24, %c0_25] : memref<3x16x16xbf16, #tpu.memory_space<vmem>>, vector<3x16x16xbf16>
    %c0_26 = arith.constant 0 : index
    %c0_27 = arith.constant 0 : index
    %65 = vector.load %arg7[%c0_26, %c0_27] : memref<3x16xf32, #tpu.memory_space<vmem>>, vector<3x16xf32>
    %66 = vector.extract_strided_slice %63 {offsets = [0, 0], sizes = [8, 16], strides = [1, 1]} : vector<8x48xf32> to vector<8x16xf32>
    %67 = arith.truncf %66 : vector<8x16xf32> to vector<8x16xbf16>
    %68 = vector.extract_strided_slice %64 {offsets = [0, 0, 0], sizes = [1, 16, 16], strides = [1, 1, 1]} : vector<3x16x16xbf16> to vector<1x16x16xbf16>
    %69 = vector.shape_cast %68 : vector<1x16x16xbf16> to vector<16x16xbf16>
    %cst_28 = arith.constant dense<0.000000e+00> : vector<8x16xf32>
    %70 = tpu.matmul %67, %69, %cst_28 {dimension_numbers = #tpu.dot_dimension_numbers<[1], [0], [0], [1], [0, 0, 1, 1], [], []>} : vector<8x16xbf16>, vector<16x16xbf16>, vector<8x16xf32> -> vector<8x16xf32>
    %71 = vector.extract_strided_slice %65 {offsets = [0, 0], sizes = [1, 16], strides = [1, 1]} : vector<3x16xf32> to vector<1x16xf32>
    %72 = vector.broadcast %71 : vector<1x16xf32> to vector<8x16xf32>
    %73 = arith.addf %70, %72 : vector<8x16xf32>
    %74 = arith.negf %73 : vector<8x16xf32>
    %75 = math.exp %74 : vector<8x16xf32>
    %cst_29 = arith.constant 1.000000e+00 : f32
    %76 = vector.broadcast %cst_29 : f32 to vector<8x16xf32>
    %77 = arith.addf %76, %75 : vector<8x16xf32>
    %78 = arith.divf %76, %77 : vector<8x16xf32>
    %79 = arith.mulf %73, %78 : vector<8x16xf32>
    %80 = arith.mulf %66, %79 : vector<8x16xf32>
    %81 = vector.extract_strided_slice %63 {offsets = [0, 16], sizes = [8, 16], strides = [1, 1]} : vector<8x48xf32> to vector<8x16xf32>
    %82 = arith.truncf %81 : vector<8x16xf32> to vector<8x16xbf16>
    %83 = vector.extract_strided_slice %64 {offsets = [1, 0, 0], sizes = [1, 16, 16], strides = [1, 1, 1]} : vector<3x16x16xbf16> to vector<1x16x16xbf16>
    %84 = vector.shape_cast %83 : vector<1x16x16xbf16> to vector<16x16xbf16>
    %cst_30 = arith.constant dense<0.000000e+00> : vector<8x16xf32>
    %85 = tpu.matmul %82, %84, %cst_30 {dimension_numbers = #tpu.dot_dimension_numbers<[1], [0], [0], [1], [0, 0, 1, 1], [], []>} : vector<8x16xbf16>, vector<16x16xbf16>, vector<8x16xf32> -> vector<8x16xf32>
    %86 = vector.extract_strided_slice %65 {offsets = [1, 0], sizes = [1, 16], strides = [1, 1]} : vector<3x16xf32> to vector<1x16xf32>
    %87 = vector.broadcast %86 : vector<1x16xf32> to vector<8x16xf32>
    %88 = arith.addf %85, %87 : vector<8x16xf32>
    %89 = arith.negf %88 : vector<8x16xf32>
    %90 = math.exp %89 : vector<8x16xf32>
    %cst_31 = arith.constant 1.000000e+00 : f32
    %91 = vector.broadcast %cst_31 : f32 to vector<8x16xf32>
    %92 = arith.addf %91, %90 : vector<8x16xf32>
    %93 = arith.divf %91, %92 : vector<8x16xf32>
    %94 = arith.mulf %88, %93 : vector<8x16xf32>
    %95 = arith.mulf %81, %94 : vector<8x16xf32>
    %96 = vector.extract_strided_slice %63 {offsets = [0, 32], sizes = [8, 16], strides = [1, 1]} : vector<8x48xf32> to vector<8x16xf32>
    %97 = arith.truncf %96 : vector<8x16xf32> to vector<8x16xbf16>
    %98 = vector.extract_strided_slice %64 {offsets = [2, 0, 0], sizes = [1, 16, 16], strides = [1, 1, 1]} : vector<3x16x16xbf16> to vector<1x16x16xbf16>
    %99 = vector.shape_cast %98 : vector<1x16x16xbf16> to vector<16x16xbf16>
    %cst_32 = arith.constant dense<0.000000e+00> : vector<8x16xf32>
    %100 = tpu.matmul %97, %99, %cst_32 {dimension_numbers = #tpu.dot_dimension_numbers<[1], [0], [0], [1], [0, 0, 1, 1], [], []>} : vector<8x16xbf16>, vector<16x16xbf16>, vector<8x16xf32> -> vector<8x16xf32>
    %101 = vector.extract_strided_slice %65 {offsets = [2, 0], sizes = [1, 16], strides = [1, 1]} : vector<3x16xf32> to vector<1x16xf32>
    %102 = vector.broadcast %101 : vector<1x16xf32> to vector<8x16xf32>
    %103 = arith.addf %100, %102 : vector<8x16xf32>
    %104 = arith.negf %103 : vector<8x16xf32>
    %105 = math.exp %104 : vector<8x16xf32>
    %cst_33 = arith.constant 1.000000e+00 : f32
    %106 = vector.broadcast %cst_33 : f32 to vector<8x16xf32>
    %107 = arith.addf %106, %105 : vector<8x16xf32>
    %108 = arith.divf %106, %107 : vector<8x16xf32>
    %109 = arith.mulf %103, %108 : vector<8x16xf32>
    %110 = arith.mulf %96, %109 : vector<8x16xf32>
    %111 = tpu.concatenate %80, %95, %110 in 1 : vector<8x16xf32>, vector<8x16xf32>, vector<8x16xf32> -> vector<8x48xf32>
    %c0_34 = arith.constant 0 : index
    %c0_35 = arith.constant 0 : index
    %112 = vector.load %arg10[%c0_34, %c0_35] : memref<3x48xf32, #tpu.memory_space<vmem>>, vector<3x48xf32>
    %cst_36 = arith.constant dense<0.000000e+00> : vector<8x48xf32>
    %113 = tpu.matmul %58, %112, %cst_36 {dimension_numbers = #tpu.dot_dimension_numbers<[1], [0], [0], [1], [0, 0, 1, 1], [], []>} : vector<8x3xf32>, vector<3x48xf32>, vector<8x48xf32> -> vector<8x48xf32>
    %114 = arith.mulf %111, %113 : vector<8x48xf32>
    %115 = arith.truncf %114 : vector<8x48xf32> to vector<8x48xbf16>
    %c0_37 = arith.constant 0 : index
    %c0_38 = arith.constant 0 : index
    %116 = vector.load %arg8[%c0_37, %c0_38] : memref<48x32xbf16, #tpu.memory_space<vmem>>, vector<48x32xbf16>
    %cst_39 = arith.constant dense<0.000000e+00> : vector<8x32xf32>
    %117 = tpu.matmul %115, %116, %cst_39 {dimension_numbers = #tpu.dot_dimension_numbers<[1], [0], [0], [1], [0, 0, 1, 1], [], []>} : vector<8x48xbf16>, vector<48x32xbf16>, vector<8x32xf32> -> vector<8x32xf32>
    %c0_40 = arith.constant 0 : index
    %c0_41 = arith.constant 0 : index
    %118 = vector.load %arg9[%c0_40, %c0_41] : memref<3x32xf32, #tpu.memory_space<vmem>>, vector<3x32xf32>
    %cst_42 = arith.constant dense<0.000000e+00> : vector<8x32xf32>
    %119 = tpu.matmul %58, %118, %cst_42 {dimension_numbers = #tpu.dot_dimension_numbers<[1], [0], [0], [1], [0, 0, 1, 1], [], []>} : vector<8x3xf32>, vector<3x32xf32>, vector<8x32xf32> -> vector<8x32xf32>
    %120 = arith.addf %117, %119 : vector<8x32xf32>
    %c0_43 = arith.constant 0 : index
    %c0_44 = arith.constant 0 : index
    %121 = vector.load %arg11[%c0_43, %c0_44] : memref<32x16xbf16, #tpu.memory_space<vmem>>, vector<32x16xbf16>
    %cst_45 = arith.constant dense<0.000000e+00> : vector<8x16xf32>
    %122 = tpu.matmul %1, %121, %cst_45 {dimension_numbers = #tpu.dot_dimension_numbers<[1], [0], [0], [1], [0, 0, 1, 1], [], []>} : vector<8x32xbf16>, vector<32x16xbf16>, vector<8x16xf32> -> vector<8x16xf32>
    %c0_46 = arith.constant 0 : index
    %c0_47 = arith.constant 0 : index
    %123 = vector.load %arg12[%c0_46, %c0_47] : memref<1x16xf32, #tpu.memory_space<vmem>>, vector<1x16xf32>
    %124 = vector.broadcast %123 : vector<1x16xf32> to vector<8x16xf32>
    %125 = arith.addf %122, %124 : vector<8x16xf32>
    %c0_48 = arith.constant 0 : index
    %c0_49 = arith.constant 0 : index
    %126 = vector.load %arg13[%c0_48, %c0_49] : memref<16x16xbf16, #tpu.memory_space<vmem>>, vector<16x16xbf16>
    %127 = arith.truncf %125 : vector<8x16xf32> to vector<8x16xbf16>
    %cst_50 = arith.constant dense<0.000000e+00> : vector<8x16xf32>
    %128 = tpu.matmul %127, %126, %cst_50 {dimension_numbers = #tpu.dot_dimension_numbers<[1], [0], [0], [1], [0, 0, 1, 1], [], []>} : vector<8x16xbf16>, vector<16x16xbf16>, vector<8x16xf32> -> vector<8x16xf32>
    %c0_51 = arith.constant 0 : index
    %c0_52 = arith.constant 0 : index
    %129 = vector.load %arg14[%c0_51, %c0_52] : memref<1x16xf32, #tpu.memory_space<vmem>>, vector<1x16xf32>
    %130 = vector.broadcast %129 : vector<1x16xf32> to vector<8x16xf32>
    %131 = arith.addf %128, %130 : vector<8x16xf32>
    %132 = arith.negf %131 : vector<8x16xf32>
    %133 = math.exp %132 : vector<8x16xf32>
    %cst_53 = arith.constant 1.000000e+00 : f32
    %134 = vector.broadcast %cst_53 : f32 to vector<8x16xf32>
    %135 = arith.addf %134, %133 : vector<8x16xf32>
    %136 = arith.divf %134, %135 : vector<8x16xf32>
    %137 = arith.mulf %131, %136 : vector<8x16xf32>
    %138 = arith.mulf %125, %137 : vector<8x16xf32>
    %139 = arith.truncf %138 : vector<8x16xf32> to vector<8x16xbf16>
    %c0_54 = arith.constant 0 : index
    %c0_55 = arith.constant 0 : index
    %140 = vector.load %arg15[%c0_54, %c0_55] : memref<16x32xbf16, #tpu.memory_space<vmem>>, vector<16x32xbf16>
    %cst_56 = arith.constant dense<0.000000e+00> : vector<8x32xf32>
    %141 = tpu.matmul %139, %140, %cst_56 {dimension_numbers = #tpu.dot_dimension_numbers<[1], [0], [0], [1], [0, 0, 1, 1], [], []>} : vector<8x16xbf16>, vector<16x32xbf16>, vector<8x32xf32> -> vector<8x32xf32>
    %c0_57 = arith.constant 0 : index
    %c0_58 = arith.constant 0 : index
    %142 = vector.load %arg16[%c0_57, %c0_58] : memref<1x32xf32, #tpu.memory_space<vmem>>, vector<1x32xf32>
    %143 = vector.broadcast %142 : vector<1x32xf32> to vector<8x32xf32>
    %144 = arith.addf %141, %143 : vector<8x32xf32>
    %145 = arith.addf %120, %144 : vector<8x32xf32>
    %c0_59 = arith.constant 0 : index
    %c0_60 = arith.constant 0 : index
    %146 = vector.load %arg17[%c0_59, %c0_60] : memref<8x32xf32, #tpu.memory_space<vmem>>, vector<8x32xf32>
    tpu.vector_store %arg17[%c0_59, %c0_60], %145 {strides = array<i32>} : memref<8x32xf32, #tpu.memory_space<vmem>>, vector<8x32xf32>,
    return
  }
  func.func @transform_0(%arg0: i32) -> (i32, i32) {
    %c0_i32 = arith.constant 0 : i32
    %c0_i32_0 = arith.constant 0 : i32
    return %arg0, %c0_i32 : i32, i32
  }
  func.func @transform_1(%arg0: i32) -> (i32, i32) {
    %c0_i32 = arith.constant 0 : i32
    %c0_i32_0 = arith.constant 0 : i32
    %c0_i32_1 = arith.constant 0 : i32
    return %c0_i32, %c0_i32_0 : i32, i32
  }
  func.func @transform_2(%arg0: i32) -> (i32, i32) {
    %c0_i32 = arith.constant 0 : i32
    %c0_i32_0 = arith.constant 0 : i32
    %c0_i32_1 = arith.constant 0 : i32
    return %c0_i32, %c0_i32_0 : i32, i32
  }
  func.func @transform_3(%arg0: i32) -> (i32, i32) {
    %c0_i32 = arith.constant 0 : i32
    %c0_i32_0 = arith.constant 0 : i32
    %c0_i32_1 = arith.constant 0 : i32
    return %c0_i32, %c0_i32_0 : i32, i32
  }
  func.func @transform_4(%arg0: i32) -> (i32, i32) {
    %c0_i32 = arith.constant 0 : i32
    %c0_i32_0 = arith.constant 0 : i32
    %c0_i32_1 = arith.constant 0 : i32
    return %c0_i32, %c0_i32_0 : i32, i32
  }
  func.func @transform_5(%arg0: i32) -> (i32, i32, i32) {
    %c0_i32 = arith.constant 0 : i32
    %c0_i32_0 = arith.constant 0 : i32
    %c0_i32_1 = arith.constant 0 : i32
    %c0_i32_2 = arith.constant 0 : i32
    return %c0_i32, %c0_i32_0, %c0_i32_1 : i32, i32, i32
  }
  func.func @transform_6(%arg0: i32) -> (i32, i32) {
    %c0_i32 = arith.constant 0 : i32
    %c0_i32_0 = arith.constant 0 : i32
    %c0_i32_1 = arith.constant 0 : i32
    return %c0_i32, %c0_i32_0 : i32, i32
  }
  func.func @transform_7(%arg0: i32) -> (i32, i32) {
    %c0_i32 = arith.constant 0 : i32
    %c0_i32_0 = arith.constant 0 : i32
    %c0_i32_1 = arith.constant 0 : i32
    return %c0_i32, %c0_i32_0 : i32, i32
  }
  func.func @transform_8(%arg0: i32) -> (i32, i32) {
    %c0_i32 = arith.constant 0 : i32
    %c0_i32_0 = arith.constant 0 : i32
    %c0_i32_1 = arith.constant 0 : i32
    return %c0_i32, %c0_i32_0 : i32, i32
  }
  func.func @transform_9(%arg0: i32) -> (i32, i32) {
    %c0_i32 = arith.constant 0 : i32
    %c0_i32_0 = arith.constant 0 : i32
    %c0_i32_1 = arith.constant 0 : i32
    return %c0_i32, %c0_i32_0 : i32, i32
  }
  func.func @transform_10(%arg0: i32) -> (i32, i32) {
    %c0_i32 = arith.constant 0 : i32
    %c0_i32_0 = arith.constant 0 : i32
    %c0_i32_1 = arith.constant 0 : i32
    return %c0_i32, %c0_i32_0 : i32, i32
  }
  func.func @transform_11(%arg0: i32) -> (i32, i32) {
    %c0_i32 = arith.constant 0 : i32
    %c0_i32_0 = arith.constant 0 : i32
    %c0_i32_1 = arith.constant 0 : i32
    return %c0_i32, %c0_i32_0 : i32, i32
  }
  func.func @transform_12(%arg0: i32) -> (i32, i32) {
    %c0_i32 = arith.constant 0 : i32
    %c0_i32_0 = arith.constant 0 : i32
    %c0_i32_1 = arith.constant 0 : i32
    return %c0_i32, %c0_i32_0 : i32, i32
  }
  func.func @transform_13(%arg0: i32) -> (i32, i32) {
    %c0_i32 = arith.constant 0 : i32
    %c0_i32_0 = arith.constant 0 : i32
    %c0_i32_1 = arith.constant 0 : i32
    return %c0_i32, %c0_i32_0 : i32, i32
  }
  func.func @transform_14(%arg0: i32) -> (i32, i32) {
    %c0_i32 = arith.constant 0 : i32
    %c0_i32_0 = arith.constant 0 : i32
    %c0_i32_1 = arith.constant 0 : i32
    return %c0_i32, %c0_i32_0 : i32, i32
  }
  func.func @transform_15(%arg0: i32) -> (i32, i32) {
    %c0_i32 = arith.constant 0 : i32
    %c0_i32_0 = arith.constant 0 : i32
    %c0_i32_1 = arith.constant 0 : i32
    return %c0_i32, %c0_i32_0 : i32, i32
  }
  func.func @transform_16(%arg0: i32) -> (i32, i32) {
    %c0_i32 = arith.constant 0 : i32
    %c0_i32_0 = arith.constant 0 : i32
    return %arg0, %c0_i32 : i32, i32
  }
}

module attributes {stable_mosaic.version = 11 : i64} {
  func.func @_moe_kernel(%arg0: i32, %arg1: memref<8x32xf32, #tpu.memory_space<vmem>>, %arg2: memref<32x4xf32, #tpu.memory_space<vmem>>, %arg3: memref<1x4xf32, #tpu.memory_space<vmem>>, %arg4: memref<32x48xbf16, #tpu.memory_space<vmem>>, %arg5: memref<1x48xf32, #tpu.memory_space<vmem>>, %arg6: memref<3x16x16xbf16, #tpu.memory_space<vmem>>, %arg7: memref<3x16xf32, #tpu.memory_space<vmem>>, %arg8: memref<48x32xbf16, #tpu.memory_space<vmem>>, %arg9: memref<3x32xf32, #tpu.memory_space<vmem>>, %arg10: memref<3x48xf32, #tpu.memory_space<vmem>>, %arg11: memref<32x16xbf16, #tpu.memory_space<vmem>>, %arg12: memref<1x16xf32, #tpu.memory_space<vmem>>, %arg13: memref<16x16xbf16, #tpu.memory_space<vmem>>, %arg14: memref<1x16xf32, #tpu.memory_space<vmem>>, %arg15: memref<16x32xbf16, #tpu.memory_space<vmem>>, %arg16: memref<1x32xf32, #tpu.memory_space<vmem>>, %arg17: memref<8x32xf32, #tpu.memory_space<vmem>>) attributes {dimension_semantics = [#tpu.dimension_semantics<parallel>], iteration_bounds = array<i64: 2>, scalar_prefetch = 0 : i64, scratch_operands = 0 : i64, tpu.core_type = #tpu.core_type<tc>, window_params = [{transform_indices = @transform_0, window_bounds = array<i64: 8, 32>}, {pipeline_mode = #tpu.pipeline_mode<synchronous>, transform_indices = @transform_1, window_bounds = array<i64: 32, 4>}, {pipeline_mode = #tpu.pipeline_mode<synchronous>, transform_indices = @transform_2, window_bounds = array<i64: 1, 4>}, {pipeline_mode = #tpu.pipeline_mode<synchronous>, transform_indices = @transform_3, window_bounds = array<i64: 32, 48>}, {pipeline_mode = #tpu.pipeline_mode<synchronous>, transform_indices = @transform_4, window_bounds = array<i64: 1, 48>}, {pipeline_mode = #tpu.pipeline_mode<synchronous>, transform_indices = @transform_5, window_bounds = array<i64: 3, 16, 16>}, {pipeline_mode = #tpu.pipeline_mode<synchronous>, transform_indices = @transform_6, window_bounds = array<i64: 3, 16>}, {pipeline_mode = #tpu.pipeline_mode<synchronous>, transform_indices = @transform_7, window_bounds = array<i64: 48, 32>}, {pipeline_mode = #tpu.pipeline_mode<synchronous>, transform_indices = @transform_8, window_bounds = array<i64: 3, 32>}, {pipeline_mode = #tpu.pipeline_mode<synchronous>, transform_indices = @transform_9, window_bounds = array<i64: 3, 48>}, {pipeline_mode = #tpu.pipeline_mode<synchronous>, transform_indices = @transform_10, window_bounds = array<i64: 32, 16>}, {pipeline_mode = #tpu.pipeline_mode<synchronous>, transform_indices = @transform_11, window_bounds = array<i64: 1, 16>}, {pipeline_mode = #tpu.pipeline_mode<synchronous>, transform_indices = @transform_12, window_bounds = array<i64: 16, 16>}, {pipeline_mode = #tpu.pipeline_mode<synchronous>, transform_indices = @transform_13, window_bounds = array<i64: 1, 16>}, {pipeline_mode = #tpu.pipeline_mode<synchronous>, transform_indices = @transform_14, window_bounds = array<i64: 16, 32>}, {pipeline_mode = #tpu.pipeline_mode<synchronous>, transform_indices = @transform_15, window_bounds = array<i64: 1, 32>}, {transform_indices = @transform_16, window_bounds = array<i64: 8, 32>}]} {
    %c0 = arith.constant 0 : index
    %c0_0 = arith.constant 0 : index
    %0 = vector.load %arg1[%c0, %c0_0] : memref<8x32xf32, #tpu.memory_space<vmem>>, vector<8x32xf32>
    %1 = arith.truncf %0 : vector<8x32xf32> to vector<8x32xbf16>
    %c0_1 = arith.constant 0 : index
    %c0_2 = arith.constant 0 : index
    %2 = vector.load %arg2[%c0_1, %c0_2] : memref<32x4xf32, #tpu.memory_space<vmem>>, vector<32x4xf32>
    %cst = arith.constant dense<0.000000e+00> : vector<8x4xf32>
    %3 = tpu.matmul %0, %2, %cst {dimension_numbers = #tpu.dot_dimension_numbers<[1], [0], [0], [1], [0, 0, 1, 1], [], []>} : vector<8x32xf32>, vector<32x4xf32>, vector<8x4xf32> -> vector<8x4xf32>
    %c0_3 = arith.constant 0 : index
    %c0_4 = arith.constant 0 : index
    %4 = vector.load %arg3[%c0_3, %c0_4] : memref<1x4xf32, #tpu.memory_space<vmem>>, vector<1x4xf32>
    %5 = vector.broadcast %4 : vector<1x4xf32> to vector<8x4xf32>
    %6 = arith.addf %3, %5 : vector<8x4xf32>
    %7 = tpu.iota {dimensions = array<i32: 1>} : vector<8x4xi32>
    %false = arith.constant false
    %8 = vector.broadcast %false : i1 to vector<8x4xi1>
    %cst_5 = arith.constant dense<0xFF800000> : vector<8xf32>
    %9 = vector.multi_reduction <maximumf>, %6, %cst_5 [1] : vector<8x4xf32> to vector<8xf32>
    %10 = vector.shape_cast %9 : vector<8xf32> to vector<8x1xf32>
    %11 = vector.broadcast %10 : vector<8x1xf32> to vector<8x4xf32>
    %12 = arith.cmpf oeq, %6, %11 : vector<8x4xf32>
    %c4_i32 = arith.constant 4 : i32
    %13 = vector.broadcast %c4_i32 : i32 to vector<8x4xi32>
    %14 = arith.select %12, %7, %13 : vector<8x4xi1>, vector<8x4xi32>
    %cst_6 = arith.constant dense<2147483647> : vector<8xi32>
    %15 = vector.multi_reduction <minsi>, %14, %cst_6 [1] : vector<8x4xi32> to vector<8xi32>
    %16 = vector.shape_cast %15 : vector<8xi32> to vector<8x1xi32>
    %17 = vector.broadcast %16 : vector<8x1xi32> to vector<8x4xi32>
    %18 = arith.cmpi eq, %7, %17 : vector<8x4xi32>
    %19 = arith.ori %8, %18 : vector<8x4xi1>
    %cst_7 = arith.constant 0xFF800000 : f32
    %20 = vector.broadcast %cst_7 : f32 to vector<8x4xf32>
    %21 = arith.select %18, %20, %6 : vector<8x4xi1>, vector<8x4xf32>
    %cst_8 = arith.constant dense<0xFF800000> : vector<8xf32>
    %22 = vector.multi_reduction <maximumf>, %21, %cst_8 [1] : vector<8x4xf32> to vector<8xf32>
    %23 = vector.shape_cast %22 : vector<8xf32> to vector<8x1xf32>
    %24 = vector.broadcast %23 : vector<8x1xf32> to vector<8x4xf32>
    %25 = arith.cmpf oeq, %21, %24 : vector<8x4xf32>
    %c4_i32_9 = arith.constant 4 : i32
    %26 = vector.broadcast %c4_i32_9 : i32 to vector<8x4xi32>
    %27 = arith.select %25, %7, %26 : vector<8x4xi1>, vector<8x4xi32>
    %cst_10 = arith.constant dense<2147483647> : vector<8xi32>
    %28 = vector.multi_reduction <minsi>, %27, %cst_10 [1] : vector<8x4xi32> to vector<8xi32>
    %29 = vector.shape_cast %28 : vector<8xi32> to vector<8x1xi32>
    %30 = vector.broadcast %29 : vector<8x1xi32> to vector<8x4xi32>
    %31 = arith.cmpi eq, %7, %30 : vector<8x4xi32>
    %32 = arith.ori %19, %31 : vector<8x4xi1>
    %cst_11 = arith.constant 0xFF800000 : f32
    %33 = vector.broadcast %cst_11 : f32 to vector<8x4xf32>
    %34 = arith.select %31, %33, %21 : vector<8x4xi1>, vector<8x4xf32>
    %cst_12 = arith.constant dense<0xFF800000> : vector<8xf32>
    %35 = vector.multi_reduction <maximumf>, %34, %cst_12 [1] : vector<8x4xf32> to vector<8xf32>
    %36 = vector.shape_cast %35 : vector<8xf32> to vector<8x1xf32>
    %37 = vector.broadcast %36 : vector<8x1xf32> to vector<8x4xf32>
    %38 = arith.cmpf oeq, %34, %37 : vector<8x4xf32>
    %c4_i32_13 = arith.constant 4 : i32
    %39 = vector.broadcast %c4_i32_13 : i32 to vector<8x4xi32>
    %40 = arith.select %38, %7, %39 : vector<8x4xi1>, vector<8x4xi32>
    %cst_14 = arith.constant dense<2147483647> : vector<8xi32>
    %41 = vector.multi_reduction <minsi>, %40, %cst_14 [1] : vector<8x4xi32> to vector<8xi32>
    %42 = vector.shape_cast %41 : vector<8xi32> to vector<8x1xi32>
    %43 = vector.broadcast %42 : vector<8x1xi32> to vector<8x4xi32>
    %44 = arith.cmpi eq, %7, %43 : vector<8x4xi32>
    %45 = arith.ori %32, %44 : vector<8x4xi1>
    %cst_15 = arith.constant dense<0xFF800000> : vector<8xf32>
    %46 = vector.multi_reduction <maximumf>, %6, %cst_15 [1] : vector<8x4xf32> to vector<8xf32>
    %47 = vector.shape_cast %46 : vector<8xf32> to vector<8x1xf32>
    %48 = vector.broadcast %47 : vector<8x1xf32> to vector<8x4xf32>
    %49 = arith.subf %6, %48 : vector<8x4xf32>
    %50 = math.exp %49 : vector<8x4xf32>
    %cst_16 = arith.constant 0.000000e+00 : f32
    %51 = vector.broadcast %cst_16 : f32 to vector<8x4xf32>
    %52 = arith.select %45, %50, %51 : vector<8x4xi1>, vector<8x4xf32>
    %cst_17 = arith.constant dense<0.000000e+00> : vector<8xf32>
    %53 = vector.multi_reduction <add>, %52, %cst_17 [1] : vector<8x4xf32> to vector<8xf32>
    %54 = vector.shape_cast %53 : vector<8xf32> to vector<8x1xf32>
    %55 = tpu.reciprocal %54 {approx = true} : vector<8x1xf32> -> vector<8x1xf32>
    %56 = vector.broadcast %55 : vector<8x1xf32> to vector<8x4xf32>
    %57 = arith.mulf %52, %56 : vector<8x4xf32>
    %58 = vector.extract_strided_slice %57 {offsets = [0, 0], sizes = [8, 3], strides = [1, 1]} : vector<8x4xf32> to vector<8x3xf32>
    %c0_18 = arith.constant 0 : index
    %c0_19 = arith.constant 0 : index
    %59 = vector.load %arg4[%c0_18, %c0_19] : memref<32x48xbf16, #tpu.memory_space<vmem>>, vector<32x48xbf16>
    %cst_20 = arith.constant dense<0.000000e+00> : vector<8x48xf32>
    %60 = tpu.matmul %1, %59, %cst_20 {dimension_numbers = #tpu.dot_dimension_numbers<[1], [0], [0], [1], [0, 0, 1, 1], [], []>} : vector<8x32xbf16>, vector<32x48xbf16>, vector<8x48xf32> -> vector<8x48xf32>
    %c0_21 = arith.constant 0 : index
    %c0_22 = arith.constant 0 : index
    %61 = vector.load %arg5[%c0_21, %c0_22] : memref<1x48xf32, #tpu.memory_space<vmem>>, vector<1x48xf32>
    %62 = vector.broadcast %61 : vector<1x48xf32> to vector<8x48xf32>
    %63 = arith.addf %60, %62 : vector<8x48xf32>
    %c0_23 = arith.constant 0 : index
    %c0_24 = arith.constant 0 : index
    %c0_25 = arith.constant 0 : index
    %64 = vector.load %arg6[%c0_23, %c0_24, %c0_25] : memref<3x16x16xbf16, #tpu.memory_space<vmem>>, vector<3x16x16xbf16>
    %c0_26 = arith.constant 0 : index
    %c0_27 = arith.constant 0 : index
    %65 = vector.load %arg7[%c0_26, %c0_27] : memref<3x16xf32, #tpu.memory_space<vmem>>, vector<3x16xf32>
    %66 = vector.extract_strided_slice %63 {offsets = [0, 0], sizes = [8, 16], strides = [1, 1]} : vector<8x48xf32> to vector<8x16xf32>
    %67 = arith.truncf %66 : vector<8x16xf32> to vector<8x16xbf16>
    %68 = vector.extract_strided_slice %64 {offsets = [0, 0, 0], sizes = [1, 16, 16], strides = [1, 1, 1]} : vector<3x16x16xbf16> to vector<1x16x16xbf16>
    %69 = vector.shape_cast %68 : vector<1x16x16xbf16> to vector<16x16xbf16>
    %cst_28 = arith.constant dense<0.000000e+00> : vector<8x16xf32>
    %70 = tpu.matmul %67, %69, %cst_28 {dimension_numbers = #tpu.dot_dimension_numbers<[1], [0], [0], [1], [0, 0, 1, 1], [], []>} : vector<8x16xbf16>, vector<16x16xbf16>, vector<8x16xf32> -> vector<8x16xf32>
    %71 = vector.extract_strided_slice %65 {offsets = [0, 0], sizes = [1, 16], strides = [1, 1]} : vector<3x16xf32> to vector<1x16xf32>
    %72 = vector.broadcast %71 : vector<1x16xf32> to vector<8x16xf32>
    %73 = arith.addf %70, %72 : vector<8x16xf32>
    %74 = arith.negf %73 : vector<8x16xf32>
    %75 = math.exp %74 : vector<8x16xf32>
    %cst_29 = arith.constant 1.000000e+00 : f32
    %76 = vector.broadcast %cst_29 : f32 to vector<8x16xf32>
    %77 = arith.addf %76, %75 : vector<8x16xf32>
    %78 = arith.divf %76, %77 : vector<8x16xf32>
    %79 = arith.mulf %73, %78 : vector<8x16xf32>
    %80 = arith.mulf %66, %79 : vector<8x16xf32>
    %81 = vector.extract_strided_slice %63 {offsets = [0, 16], sizes = [8, 16], strides = [1, 1]} : vector<8x48xf32> to vector<8x16xf32>
    %82 = arith.truncf %81 : vector<8x16xf32> to vector<8x16xbf16>
    %83 = vector.extract_strided_slice %64 {offsets = [1, 0, 0], sizes = [1, 16, 16], strides = [1, 1, 1]} : vector<3x16x16xbf16> to vector<1x16x16xbf16>
    %84 = vector.shape_cast %83 : vector<1x16x16xbf16> to vector<16x16xbf16>
    %cst_30 = arith.constant dense<0.000000e+00> : vector<8x16xf32>
    %85 = tpu.matmul %82, %84, %cst_30 {dimension_numbers = #tpu.dot_dimension_numbers<[1], [0], [0], [1], [0, 0, 1, 1], [], []>} : vector<8x16xbf16>, vector<16x16xbf16>, vector<8x16xf32> -> vector<8x16xf32>
    %86 = vector.extract_strided_slice %65 {offsets = [1, 0], sizes = [1, 16], strides = [1, 1]} : vector<3x16xf32> to vector<1x16xf32>
    %87 = vector.broadcast %86 : vector<1x16xf32> to vector<8x16xf32>
    %88 = arith.addf %85, %87 : vector<8x16xf32>
    %89 = arith.negf %88 : vector<8x16xf32>
    %90 = math.exp %89 : vector<8x16xf32>
    %cst_31 = arith.constant 1.000000e+00 : f32
    %91 = vector.broadcast %cst_31 : f32 to vector<8x16xf32>
    %92 = arith.addf %91, %90 : vector<8x16xf32>
    %93 = arith.divf %91, %92 : vector<8x16xf32>
    %94 = arith.mulf %88, %93 : vector<8x16xf32>
    %95 = arith.mulf %81, %94 : vector<8x16xf32>
    %96 = vector.extract_strided_slice %63 {offsets = [0, 32], sizes = [8, 16], strides = [1, 1]} : vector<8x48xf32> to vector<8x16xf32>
    %97 = arith.truncf %96 : vector<8x16xf32> to vector<8x16xbf16>
    %98 = vector.extract_strided_slice %64 {offsets = [2, 0, 0], sizes = [1, 16, 16], strides = [1, 1, 1]} : vector<3x16x16xbf16> to vector<1x16x16xbf16>
    %99 = vector.shape_cast %98 : vector<1x16x16xbf16> to vector<16x16xbf16>
    %cst_32 = arith.constant dense<0.000000e+00> : vector<8x16xf32>
    %100 = tpu.matmul %97, %99, %cst_32 {dimension_numbers = #tpu.dot_dimension_numbers<[1], [0], [0], [1], [0, 0, 1, 1], [], []>} : vector<8x16xbf16>, vector<16x16xbf16>, vector<8x16xf32> -> vector<8x16xf32>
    %101 = vector.extract_strided_slice %65 {offsets = [2, 0], sizes = [1, 16], strides = [1, 1]} : vector<3x16xf32> to vector<1x16xf32>
    %102 = vector.broadcast %101 : vector<1x16xf32> to vector<8x16xf32>
    %103 = arith.addf %100, %102 : vector<8x16xf32>
    %104 = arith.negf %103 : vector<8x16xf32>
    %105 = math.exp %104 : vector<8x16xf32>
    %cst_33 = arith.constant 1.000000e+00 : f32
    %106 = vector.broadcast %cst_33 : f32 to vector<8x16xf32>
    %107 = arith.addf %106, %105 : vector<8x16xf32>
    %108 = arith.divf %106, %107 : vector<8x16xf32>
    %109 = arith.mulf %103, %108 : vector<8x16xf32>
    %110 = arith.mulf %96, %109 : vector<8x16xf32>
    %111 = tpu.concatenate %80, %95, %110 in 1 : vector<8x16xf32>, vector<8x16xf32>, vector<8x16xf32> -> vector<8x48xf32>
    %c0_34 = arith.constant 0 : index
    %c0_35 = arith.constant 0 : index
    %112 = vector.load %arg10[%c0_34, %c0_35] : memref<3x48xf32, #tpu.memory_space<vmem>>, vector<3x48xf32>
    %cst_36 = arith.constant dense<0.000000e+00> : vector<8x48xf32>
    %113 = tpu.matmul %58, %112, %cst_36 {dimension_numbers = #tpu.dot_dimension_numbers<[1], [0], [0], [1], [0, 0, 1, 1], [], []>} : vector<8x3xf32>, vector<3x48xf32>, vector<8x48xf32> -> vector<8x48xf32>
    %114 = arith.mulf %111, %113 : vector<8x48xf32>
    %115 = arith.truncf %114 : vector<8x48xf32> to vector<8x48xbf16>
    %c0_37 = arith.constant 0 : index
    %c0_38 = arith.constant 0 : index
    %116 = vector.load %arg8[%c0_37, %c0_38] : memref<48x32xbf16, #tpu.memory_space<vmem>>, vector<48x32xbf16>
    %cst_39 = arith.constant dense<0.000000e+00> : vector<8x32xf32>
    %117 = tpu.matmul %115, %116, %cst_39 {dimension_numbers = #tpu.dot_dimension_numbers<[1], [0], [0], [1], [0, 0, 1, 1], [], []>} : vector<8x48xbf16>, vector<48x32xbf16>, vector<8x32xf32> -> vector<8x32xf32>
    %c0_40 = arith.constant 0 : index
    %c0_41 = arith.constant 0 : index
    %118 = vector.load %arg9[%c0_40, %c0_41] : memref<3x32xf32, #tpu.memory_space<vmem>>, vector<3x32xf32>
    %cst_42 = arith.constant dense<0.000000e+00> : vector<8x32xf32>
    %119 = tpu.matmul %58, %118, %cst_42 {dimension_numbers = #tpu.dot_dimension_numbers<[1], [0], [0], [1], [0, 0, 1, 1], [], []>} : vector<8x3xf32>, vector<3x32xf32>, vector<8x32xf32> -> vector<8x32xf32>
    %120 = arith.addf %117, %119 : vector<8x32xf32>
    %c0_43 = arith.constant 0 : index
    %c0_44 = arith.constant 0 : index
    %121 = vector.load %arg11[%c0_43, %c0_44] : memref<32x16xbf16, #tpu.memory_space<vmem>>, vector<32x16xbf16>
    %cst_45 = arith.constant dense<0.000000e+00> : vector<8x16xf32>
    %122 = tpu.matmul %1, %121, %cst_45 {dimension_numbers = #tpu.dot_dimension_numbers<[1], [0], [0], [1], [0, 0, 1, 1], [], []>} : vector<8x32xbf16>, vector<32x16xbf16>, vector<8x16xf32> -> vector<8x16xf32>
    %c0_46 = arith.constant 0 : index
    %c0_47 = arith.constant 0 : index
    %123 = vector.load %arg12[%c0_46, %c0_47] : memref<1x16xf32, #tpu.memory_space<vmem>>, vector<1x16xf32>
    %124 = vector.broadcast %123 : vector<1x16xf32> to vector<8x16xf32>
    %125 = arith.addf %122, %124 : vector<8x16xf32>
    %c0_48 = arith.constant 0 : index
    %c0_49 = arith.constant 0 : index
    %126 = vector.load %arg13[%c0_48, %c0_49] : memref<16x16xbf16, #tpu.memory_space<vmem>>, vector<16x16xbf16>
    %127 = arith.truncf %125 : vector<8x16xf32> to vector<8x16xbf16>
    %cst_50 = arith.constant dense<0.000000e+00> : vector<8x16xf32>
    %128 = tpu.matmul %127, %126, %cst_50 {dimension_numbers = #tpu.dot_dimension_numbers<[1], [0], [0], [1], [0, 0, 1, 1], [], []>} : vector<8x16xbf16>, vector<16x16xbf16>, vector<8x16xf32> -> vector<8x16xf32>
    %c0_51 = arith.constant 0 : index
    %c0_52 = arith.constant 0 : index
    %129 = vector.load %arg14[%c0_51, %c0_52] : memref<1x16xf32, #tpu.memory_space<vmem>>, vector<1x16xf32>
    %130 = vector.broadcast %129 : vector<1x16xf32> to vector<8x16xf32>
    %131 = arith.addf %128, %130 : vector<8x16xf32>
    %132 = arith.negf %131 : vector<8x16xf32>
    %133 = math.exp %132 : vector<8x16xf32>
    %cst_53 = arith.constant 1.000000e+00 : f32
    %134 = vector.broadcast %cst_53 : f32 to vector<8x16xf32>
    %135 = arith.addf %134, %133 : vector<8x16xf32>
    %136 = arith.divf %134, %135 : vector<8x16xf32>
    %137 = arith.mulf %131, %136 : vector<8x16xf32>
    %138 = arith.mulf %125, %137 : vector<8x16xf32>
    %139 = arith.truncf %138 : vector<8x16xf32> to vector<8x16xbf16>
    %c0_54 = arith.constant 0 : index
    %c0_55 = arith.constant 0 : index
    %140 = vector.load %arg15[%c0_54, %c0_55] : memref<16x32xbf16, #tpu.memory_space<vmem>>, vector<16x32xbf16>
    %cst_56 = arith.constant dense<0.000000e+00> : vector<8x32xf32>
    %141 = tpu.matmul %139, %140, %cst_56 {dimension_numbers = #tpu.dot_dimension_numbers<[1], [0], [0], [1], [0, 0, 1, 1], [], []>} : vector<8x16xbf16>, vector<16x32xbf16>, vector<8x32xf32> -> vector<8x32xf32>
    %c0_57 = arith.constant 0 : index
    %c0_58 = arith.constant 0 : index
    %142 = vector.load %arg16[%c0_57, %c0_58] : memref<1x32xf32, #tpu.memory_space<vmem>>, vector<1x32xf32>
    %143 = vector.broadcast %142 : vector<1x32xf32> to vector<8x32xf32>
    %144 = arith.addf %141, %143 : vector<8x32xf32>
    %145 = arith.addf %120, %144 : vector<8x32xf32>
    %c0_59 = arith.constant 0 : index
    %c0_60 = arith.constant 0 : index
    %146 = vector.load %arg17[%c0_59, %c0_60] : memref<8x32xf32, #tpu.memory_space<vmem>>, vector<8x32xf32>
    tpu.vector_store %arg17[%c0_59, %c0_60], %145 {strides = array<i32>} : memref<8x32xf32, #tpu.memory_space<vmem>>, vector<8x32xf32>,
    return
  }
  func.func @transform_0(%arg0: i32) -> (i32, i32) {
    %c0_i32 = arith.constant 0 : i32
    %c0_i32_0 = arith.constant 0 : i32
    return %arg0, %c0_i32 : i32, i32
  }
  func.func @transform_1(%arg0: i32) -> (i32, i32) {
    %c0_i32 = arith.constant 0 : i32
    %c0_i32_0 = arith.constant 0 : i32
    %c0_i32_1 = arith.constant 0 : i32
    return %c0_i32, %c0_i32_0 : i32, i32
  }
  func.func @transform_2(%arg0: i32) -> (i32, i32) {
    %c0_i32 = arith.constant 0 : i32
    %c0_i32_0 = arith.constant 0 : i32
    %c0_i32_1 = arith.constant 0 : i32
    return %c0_i32, %c0_i32_0 : i32, i32
  }
  func.func @transform_3(%arg0: i32) -> (i32, i32) {
    %c0_i32 = arith.constant 0 : i32
    %c0_i32_0 = arith.constant 0 : i32
    %c0_i32_1 = arith.constant 0 : i32
    return %c0_i32, %c0_i32_0 : i32, i32
  }
  func.func @transform_4(%arg0: i32) -> (i32, i32) {
    %c0_i32 = arith.constant 0 : i32
    %c0_i32_0 = arith.constant 0 : i32
    %c0_i32_1 = arith.constant 0 : i32
    return %c0_i32, %c0_i32_0 : i32, i32
  }
  func.func @transform_5(%arg0: i32) -> (i32, i32, i32) {
    %c0_i32 = arith.constant 0 : i32
    %c0_i32_0 = arith.constant 0 : i32
    %c0_i32_1 = arith.constant 0 : i32
    %c0_i32_2 = arith.constant 0 : i32
    return %c0_i32, %c0_i32_0, %c0_i32_1 : i32, i32, i32
  }
  func.func @transform_6(%arg0: i32) -> (i32, i32) {
    %c0_i32 = arith.constant 0 : i32
    %c0_i32_0 = arith.constant 0 : i32
    %c0_i32_1 = arith.constant 0 : i32
    return %c0_i32, %c0_i32_0 : i32, i32
  }
  func.func @transform_7(%arg0: i32) -> (i32, i32) {
    %c0_i32 = arith.constant 0 : i32
    %c0_i32_0 = arith.constant 0 : i32
    %c0_i32_1 = arith.constant 0 : i32
    return %c0_i32, %c0_i32_0 : i32, i32
  }
  func.func @transform_8(%arg0: i32) -> (i32, i32) {
    %c0_i32 = arith.constant 0 : i32
    %c0_i32_0 = arith.constant 0 : i32
    %c0_i32_1 = arith.constant 0 : i32
    return %c0_i32, %c0_i32_0 : i32, i32
  }
  func.func @transform_9(%arg0: i32) -> (i32, i32) {
    %c0_i32 = arith.constant 0 : i32
    %c0_i32_0 = arith.constant 0 : i32
    %c0_i32_1 = arith.constant 0 : i32
    return %c0_i32, %c0_i32_0 : i32, i32
  }
  func.func @transform_10(%arg0: i32) -> (i32, i32) {
    %c0_i32 = arith.constant 0 : i32
    %c0_i32_0 = arith.constant 0 : i32
    %c0_i32_1 = arith.constant 0 : i32
    return %c0_i32, %c0_i32_0 : i32, i32
  }
  func.func @transform_11(%arg0: i32) -> (i32, i32) {
    %c0_i32 = arith.constant 0 : i32
    %c0_i32_0 = arith.constant 0 : i32
    %c0_i32_1 = arith.constant 0 : i32
    return %c0_i32, %c0_i32_0 : i32, i32
  }
  func.func @transform_12(%arg0: i32) -> (i32, i32) {
    %c0_i32 = arith.constant 0 : i32
    %c0_i32_0 = arith.constant 0 : i32
    %c0_i32_1 = arith.constant 0 : i32
    return %c0_i32, %c0_i32_0 : i32, i32
  }
  func.func @transform_13(%arg0: i32) -> (i32, i32) {
    %c0_i32 = arith.constant 0 : i32
    %c0_i32_0 = arith.constant 0 : i32
    %c0_i32_1 = arith.constant 0 : i32
    return %c0_i32, %c0_i32_0 : i32, i32
  }
  func.func @transform_14(%arg0: i32) -> (i32, i32) {
    %c0_i32 = arith.constant 0 : i32
    %c0_i32_0 = arith.constant 0 : i32
    %c0_i32_1 = arith.constant 0 : i32
    return %c0_i32, %c0_i32_0 : i32, i32
  }
  func.func @transform_15(%arg0: i32) -> (i32, i32) {
    %c0_i32 = arith.constant 0 : i32
    %c0_i32_0 = arith.constant 0 : i32
    %c0_i32_1 = arith.constant 0 : i32
    return %c0_i32, %c0_i32_0 : i32, i32
  }
  func.func @transform_16(%arg0: i32) -> (i32, i32) {
    %c0_i32 = arith.constant 0 : i32
    %c0_i32_0 = arith.constant 0 : i32
    return %arg0, %c0_i32 : i32, i32
  }
}

</mosaic_0001>

<bundles_post_ra>
// kernel: tpu_custom_call.1
= control target key start
LH: loop header
LB: loop body
LE: loop exit
PB: predicated region body
PF: predicated region fallthrough
CT: control target
= control target key end

     0   :  { %s1875_s0 = inlined_call_operand.vmem [shape: f32[16,32], index: 0, kind: input, shape index: {}]   ;;  %s1876_s1 = inlined_call_operand.vmem [shape: f32[32,4], index: 1, kind: input, shape index: {}]   ;;  %s1877_s2 = inlined_call_operand.vmem [shape: f32[1,4], index: 2, kind: input, shape index: {}]   ;;  %s1878_s3 = inlined_call_operand.vmem [shape: bf16[32,48], index: 3, kind: input, shape index: {}]   ;;  %s1879_s4 = inlined_call_operand.hbm [shape: f32[1,48], index: 4, kind: input, shape index: {}]   ;;  %s1880_s5 = inlined_call_operand.vmem [shape: bf16[3,16,16], index: 5, kind: input, shape index: {}]   ;;  %s1881_s6 = inlined_call_operand.vmem [shape: f32[3,16], index: 6, kind: input, shape index: {}]   ;;  %s1882_s7 = inlined_call_operand.vmem [shape: bf16[48,32], index: 7, kind: input, shape index: {}]   ;;  %s1883_s8 = inlined_call_operand.vmem [shape: f32[3,32], index: 8, kind: input, shape index: {}]   ;;  %s1884_s9 = inlined_call_operand.hbm [shape: f32[3,48], index: 9, kind: input, shape index: {}]   ;;  %s1885_s10 = inlined_call_operand.vmem [shape: bf16[32,16], index: 10, kind: input, shape index: {}]   ;;  %s1886_s11 = inlined_call_operand.hbm [shape: f32[1,16], index: 11, kind: input, shape index: {}]   ;;  %s1887_s12 = inlined_call_operand.vmem [shape: bf16[16,16], index: 12, kind: input, shape index: {}]   ;;  %s1888_s13 = inlined_call_operand.vmem [shape: f32[1,16], index: 13, kind: input, shape index: {}]   ;;  %s1889_s14 = inlined_call_operand.vmem [shape: bf16[16,32], index: 14, kind: input, shape index: {}]   ;;  %s1890_s15 = inlined_call_operand.vmem [shape: f32[1,32], index: 15, kind: input, shape index: {}]   ;;  %s1891_s16 = inlined_call_operand.hbm [shape: f32[16,32], index: 16, kind: output, shape index: {}]  }
   0x1   :  { %1898 = sst [smem:[#allocation18_spill]] %s1875_s0 }
   0x2   :  { %1899 = sst [smem:[#allocation19_spill]] %s1884_s9 }
   0x3   :  { %21 = vsyncpa [#allocation3], 0 }
   0x4   :  { %22 = vsyncpa [#allocation6], 0 }
   0x5   :  { %23 = vsyncpa [#allocation4], 0 }
   0x6   :  { %25 = vsyncpa [#allocation4 + $0x1], 0  ;;  %s1629_s21 = smov 0   ;;  %s1631_s22 = smov 0  }
   0x7   :  { %s1633_s23 = smov 0   ;;  %s1635_s24 = smov 0  }
   0x8 LB: > { %1900 = sst [smem:[#allocation12_spill]] %s1523_s21  ;;  %s1650_s25 = sadd.s32 4294967295, %s1535_s24   ;;  %s1535_s24 = sphi %s1635_s24, %s1914_s24   ;;  %s1531_s23 = sphi %s1633_s23, %s1916_s23   ;;  %s1527_s22 = sphi %s1631_s22, %s1918_s22   ;;  %s1523_s21 = sphi %s1629_s21, %s1917_s21  }
   0x9   : > { %1901 = sst [smem:[#allocation13_spill]] %s1531_s23  ;;  %s1183_s26 = sadd.s32 4294967294, %s1535_s24  }
   0xa   : > { %1902 = sst [smem:[#allocation14_spill]] %s1535_s24  ;;  %s1654_s27 = sadd.s32 1, %s1535_s24  }
   0xb   : > { %1903 = sst [smem:[#allocation15_spill]] %s1654_s27  ;;  %s379_s28 = sadd.s32 1, %s1531_s23 }
   0xc   : > { %s376_s29 = ssub.s32 %s1535_s24, %s1654_s27  ;;  %p389_p0 = scmp.ne.s32.totalorder %s1531_s23, %s1527_s22 }
   0xd   : > { %p377_p1 = scmp.eq.s32.totalorder %s376_s29, 0  ;;  %p390_p2 = scmp.eq.s32.totalorder %s1650_s25, 1 }
   0xe   : > { %p395_p3 = scmp.ne.s32.totalorder %s1527_s22, %s1523_s21  ;;  %p396_p4 = scmp.eq.s32.totalorder %s1183_s26, 1 }
   0xf   : > { %s1665_s30 = scalar_select %p377_p1, %s1531_s23, %s379_s28  }
  0x10   : > { %p1667_p5 = por %p390_p2, %p389_p0  ;;  %p1671_p6 = por %p396_p4, %p395_p3 }
  0x11   : > { %1904 = sst [smem:[#allocation16_spill]] %s1665_s30  ;;  %p1184_p7 = scmp.ge.s32.totalorder %s1535_s24, 1 }
  0x12   : > { %s1906_s17 = scalar_select %p1671_p6, 1, 0 }
  0x13   : > { %p403_p8 = scmp.lt.s32.totalorder %s1535_s24, 3  ;;  %p1304_p9 = scmp.eq.s32.totalorder %s1650_s25, 0 }
  0x14   : > { %1907 = sst [smem:[#allocation17_spill]] %s1906_s17  ;;  %s1537_s28 = smov [#allocation5]  }
  0x15   : > { %p1678_p10 = pnand %p1184_p7, %p403_p8  ;;  %s1909_s9 = sld [smem:[#allocation19_spill]] }
  0x16   : > { %s450_s29 = sshll.u32 %s1537_s28, 4  ;;  %s424_s27 = sshll.u32 %s1879_s4, 4  ;;  %s451_s29 = int_to_ptr.vmem [resolvable:$true] %s450_s29  ;;  %s425_s27 = int_to_ptr.hbm [resolvable:$true] %s424_s27 }
  0x17   : > { %p1290_p11 = pneg %p1678_p10  ;;  %s463_s24 = sshll.u32 %s1886_s11, 4  ;;  %s464_s24 = int_to_ptr.hbm [resolvable:$true] %s463_s24 }
  0x18   : > { %s1538_s19 = smov [#allocation2]  }
  0x19   : > { %p1291_p12 = pnand %p1304_p9, %p1290_p11  ;;  %s426_s20 = sshll.u32 %s1538_s19, 4  ;;  %s427_s20 = int_to_ptr.vmem [resolvable:$true] %s426_s20 }
  0x1b   : > { %s448_s26 = sshll.u32 %s1909_s9, 4  ;;  %s1539_s9 = smov [#allocation7]   ;;  %s449_s26 = int_to_ptr.hbm [resolvable:$true] %s448_s26 }
  0x1c   : > { %1296 = dma.hbm_to_vmem [thread:$0]  (!%p1291_p12), %s449_s26, 64, %s451_s29, [#allocation6]  }
  0x1d   : > { %1293 = dma.hbm_to_vmem [thread:$0]  (!%p1291_p12), %s425_s27, 16, %s427_s20, [#allocation3]  }
  0x1e   : > { %s465_s28 = sshll.u32 %s1539_s9, 4  ;;  %497 = sbr.rel (%p1678_p10) target bundleno = 1839 (0x72f), region = 84  ;;  %s466_s28 = int_to_ptr.vmem [resolvable:$true] %s465_s28 }
  0x1f   : > { %1299 = dma.hbm_to_vmem [thread:$0]  (!%p1291_p12), %s464_s24, 16, %s466_s28, [#allocation6]  }
  0x23   : > { %1510 = dma.done.wait (%p1304_p9), [#allocation3], 16  }
  0x24   : > { %1512 = vsyncadd (%p1304_p9), [#allocation3], 4294967280 }
  0x25   : > { %1514 = dma.done.wait (%p1304_p9), [#allocation6], 80  }
  0x26   : > { %1516 = vsyncadd (%p1304_p9), [#allocation6], 4294967216  ;;  %p557_p13 = scmp.lt.s32.totalorder %s1650_s25, 1  ;;  %v567_v0 = vld [vmem:[%s1876_s1 + $0x18] sm:$0xff]  ;;  %v566_v1 = vld [vmem:[%s1876_s1 + $0x10] sm:$0xff]  ;;  %s1910_s19 = sld [smem:[#allocation18_spill]]  ;;  %v596_v9 = vlaneseq }
  0x27   : > { %588 = vmatpush.msra.mxu0 %v567_v0  ;;  %v565_v2 = vld [vmem:[%s1876_s1 + $0x8] sm:$0xff]  ;;  %v564_v3 = vld [vmem:[%s1876_s1] sm:$0xff]  ;;  %vm572_vm0 = vcmask 261120   ;;  %vm598_vm1 = vcmask 31744   ;;  %vm726_vm9 = vcmask 130048   ;;  %s1540_s29 = smov 112  }
  0x28   : > { %s558_s9 = scalar_select %p557_p13, %s1650_s25, 1  ;;  %v1350_v5 = vld [vmem:[%s1877_s2] ss:$0 sm:$0xff]  ;;  %v1730_v10 = vand.u32 127, %v596_v9  ;;  %v1265_v36 = vld [vmem:[%s1878_s3 + $0x8] sm:$0xff]  ;;  %v1268_v63 = vld [vmem:[%s1880_s5 + $0x10] sm:$0xff] }
  0x29   : > { %589 = vmatpush.msra.mxu0 %v566_v1  ;;  %704 = vmatpush.bf16.msra.mxu1 %v1265_v36  ;;  %v1264_v37 = vld [vmem:[%s1878_s3] sm:$0xff]  ;;  %v1267_v57 = vld [vmem:[%s1880_s5 + $0x8] sm:$0xff]  ;;  %s1541_s28 = smov 96   ;;  %vm872_vm14 = vcmask 1042432   ;;  %s1542_s27 = smov 16  }
  0x2a   : > { %s1194_s21 = sshll.u32 %s558_s9, 3  ;;  %v1351_v48 = vld [vmem:[#allocation2] ss:$0 sm:$0xff]  ;;  %784 = vmatpush.bf16.msra.mxu3 %v1267_v57  ;;  %s1261_s9 = sshll.u32 %s1650_s25, 3 }
  0x2b   : > { %590 = vmatpush.msra.mxu0 %v565_v2  ;;  %v1266_v51 = vld [vmem:[%s1880_s5] sm:$0xff]  ;;  %s1088_s30 = scalar_lea.hbm %s1891_s16, %s1261_s9 }
  0x2c   : > { %s560_s20 = scalar_lea.vmem %s1910_s19, %s1194_s21  ;;  %737 = vmatpush.bf16.msra.mxu2 %v1266_v51  ;;  %s1092_s26 = sshll.u32 %s1088_s30, 4  ;;  %s1093_s26 = int_to_ptr.hbm [resolvable:$true] %s1092_s26 }
  0x2d   : > { %v562_v4 = vld [vmem:[%s560_s20] sm:$0xff]  ;;  %591 = vmatpush.msra.mxu0 %v564_v3  ;;  %705 = vmatpush.bf16.msra.mxu1 %v1264_v37  ;;  %s1543_s20 = smov 32  }
  0x2e   : > { %1195 = vmatmul.msk.f32.vlgmr.msra.gmra.mxu0 %vm572_vm0, %v562_v4  ;;  %v1755_v38 = vpack.c.bf16 %v562_v4, %v562_v4 }
  0x2f   : > { %834 = vmatpush.bf16.msrb.mxu0 %v1268_v63  ;;  %v1271_v63 = vld [vmem:[%s1882_s7 + $0x10] sm:$0xff] }
  0x30   : > { %1204 = vmatmul.msk.bf16.vlgmr.msra.gmra.mxu1 %vm572_vm0, %v1755_v38 }
  0x31   : > { %955 = vmatpush.bf16.msrb.mxu1 %v1271_v63 }
  0xab   : > { %v593_v6 = vpop.f32.mrf.mxu0 }
  0xac   : > { %v1726_v7 = vadd.f32 %v1350_v5, %v593_v6 }
  0xad   : > { %v707_v46 = vpop.f32.mrf.mxu1 }
  0xae   : > { %v599_v8 = vsel %vm598_vm1, %v1726_v7, -inf  ;;  %v1763_v50 = vadd.f32 %v1351_v48, %v707_v46 }
  0xaf   : > { %600 = vmax.xlane.f32.xlu0 %v599_v8 }
  0xb0   : > { %v718_v55 = vpack.c.bf16 %v1763_v50, %v1763_v50 }
  0xb2   : > { %1209 = vmatmul.msk.bf16.vlgmr.msra.gmra.mxu2 %vm726_vm9, %v718_v55 }
  0xb5   : > { %v709_v47 = vpop.f32.mrf.mxu1 }
 0x122   : > { %v1732_v11 = vpop.xlane.xlu0 %600 }
 0x123   : > { %vm602_vm2 = vcmp.eq.f32.partialorder %v1726_v7, %v1732_v11  ;;  %v666_v2 = vsub.f32 %v1726_v7, %v1732_v11  ;;  %v1795_v11 = vld [vmem:[%s1881_s6] sm:$0x7] }
 0x124   : > { %v603_v12 = vsel %vm602_vm2, %v1730_v10, 4 }
 0x125   : > { %v604_v13 = vsel %vm598_vm1, %v603_v12, 2147483647  ;;  %v667_v3 = vmul.f32 1.442695, %v666_v2 }
 0x126   : > { %v606_v14 = vshra.s32 %v604_v13, 16  ;;  %v605_v16 = vand.u32 65535, %v604_v13 }
 0x127   : > { %1355 = vpow2.f32 %v667_v3 }
 0x128   : > { %v608_v15 = vcvt.s32.f32 %v606_v14  ;;  %v607_v18 = vcvt.s32.f32 %v605_v16 }
 0x12a   : > { %609 = vmin.xlane.f32.xlu0 %v608_v15 }
 0x12d   : > { %v1356_v12 = vpop.eup %1355 }
 0x135   : > { %v1780_v0 = vpop.f32.mrf.mxu2 }
 0x13d   : > { %v741_v1 = vpop.f32.mrf.mxu2 }
 0x13e   : > { %v1270_v1 = vld [vmem:[%s1882_s7 + $0x8] sm:$0xff] }
 0x13f   : > { %956 = vmatpush.bf16.msrb.mxu1 %v1270_v1 }
 0x19d   : > { %v610_v17 = vpop.xlane.xlu0 %609 }
 0x19e   : > { %vm611_vm3 = vcmp.eq.f32.partialorder %v608_v15, %v610_v17  ;;  %v616_v20 = vcvt.f32.s32 %v610_v17  ;;  %v764_v15 = vperm.slane %v1795_v11, 1 }
 0x19f   : > { %v612_v19 = vsel %vm611_vm3, %v607_v18, inf  ;;  %v867_v18 = vld [vmem:[#allocation5] sm:$0x7] }
 0x1a0   : > { %613 = vmin.xlane.f32.xlu1 %v612_v19  ;;  %v617_v22 = vshll.u32 %v616_v20, 16  ;;  %1223 = vmatpush.msk.msrb.mxu2 %vm872_vm14, %v867_v18 }
 0x213   : > { %v614_v21 = vpop.xlane.xlu1 %613 }
 0x214   : > { %v615_v23 = vcvt.f32.s32 %v614_v21 }
 0x216   : > { %v1738_v24 = vadd.s32 %v617_v22, %v615_v23 }
 0x218   : > { %vm619_vm4 = vcmp.eq.s32.totalorder %v1730_v10, %v1738_v24 }
 0x219   : > { %v620_v25 = vsel %vm619_vm4, -inf, %v1726_v7 }
 0x21a   : > { %v621_v26 = vsel %vm598_vm1, %v620_v25, -inf }
 0x21b   : > { %622 = vmax.xlane.f32.xlu1 %v621_v26 }
 0x28e   : > { %v623_v27 = vpop.xlane.xlu1 %622 }
 0x28f   : > { %vm624_vm5 = vcmp.eq.f32.partialorder %v620_v25, %v623_v27 }
 0x290   : > { %v625_v28 = vsel %vm624_vm5, %v1730_v10, 4 }
 0x291   : > { %v626_v29 = vsel %vm598_vm1, %v625_v28, 2147483647 }
 0x292   : > { %v628_v30 = vshra.s32 %v626_v29, 16  ;;  %v627_v32 = vand.u32 65535, %v626_v29 }
 0x294   : > { %v630_v31 = vcvt.s32.f32 %v628_v30  ;;  %v629_v34 = vcvt.s32.f32 %v627_v32 }
 0x296   : > { %631 = vmin.xlane.f32.xlu2 %v630_v31 }
 0x309   : > { %v632_v33 = vpop.xlane.xlu2 %631 }
 0x30a   : > { %vm633_vm6 = vcmp.eq.f32.partialorder %v630_v31, %v632_v33  ;;  %v638_v39 = vcvt.f32.s32 %v632_v33  ;;  %v904_v33 = vld [vmem:[%s1883_s8] sm:$0x7] }
 0x30b   : > { %v634_v35 = vsel %vm633_vm6, %v629_v34, inf  ;;  %1225 = vmatpush.msk.msrb.mxu3 %vm872_vm14, %v904_v33  ;;  %v1273_v34 = vld [vmem:[%s1885_s10 + $0x8] sm:$0xff]  ;;  %vm946_vm14 = vcmask 392192  }
 0x30c   : > { %635 = vmin.xlane.f32.xlu2 %v634_v35  ;;  %v639_v41 = vshll.u32 %v638_v39, 16  ;;  %989 = vmatpush.bf16.msra.mxu2 %v1273_v34  ;;  %v1272_v35 = vld [vmem:[%s1885_s10] sm:$0xff]  ;;  %v815_v39 = vperm.slane %v1795_v11, 2 }
 0x30d   : > { %v1275_v34 = vld [vmem:[%s1889_s14] sm:$0xff] }
 0x30e   : > { %1069 = vmatpush.bf16.msra.mxu0 %v1275_v34 }
 0x310   : > { %990 = vmatpush.bf16.msra.mxu2 %v1272_v35 }
 0x37f   : > { %v636_v40 = vpop.xlane.xlu2 %635 }
 0x380   : > { %v637_v42 = vcvt.f32.s32 %v636_v40 }
 0x382   : > { %v640_v43 = vadd.s32 %v639_v41, %v637_v42 }
 0x384   : > { %vm641_vm7 = vcmp.eq.s32.totalorder %v1730_v10, %v640_v43 }
 0x385   : > { %v643_v44 = vsel %vm641_vm7, -inf, %v620_v25  ;;  %vm642_vm11 = vmor %vm619_vm4, %vm641_vm7  ;;  %vm868_vm4 = vcmask 23552  }
 0x386   : > { %v644_v45 = vsel %vm598_vm1, %v643_v44, -inf }
 0x387   : > { %645 = vmax.xlane.f32.xlu0 %v644_v45 }
 0x3fa   : > { %v646_v49 = vpop.xlane.xlu0 %645 }
 0x3fb   : > { %vm647_vm8 = vcmp.eq.f32.partialorder %v643_v44, %v646_v49 }
 0x3fc   : > { %v648_v52 = vsel %vm647_vm8, %v1730_v10, 4 }
 0x3fd   : > { %v649_v53 = vsel %vm598_vm1, %v648_v52, 2147483647 }
 0x3fe   : > { %v651_v54 = vshra.s32 %v649_v53, 16  ;;  %v650_v58 = vand.u32 65535, %v649_v53 }
 0x400   : > { %v653_v56 = vcvt.s32.f32 %v651_v54  ;;  %v652_v60 = vcvt.s32.f32 %v650_v58 }
 0x402   : > { %654 = vmin.xlane.f32.xlu1 %v653_v56 }
 0x41b   : > { %766 = vrot.lane.b32.xlu1 %v718_v55, %s1540_s29  ;;  %s1479_s29 = sshra.s32 %s1093_s26, 4  ;;  %s1480_s29 = int_to_ptr.hbm [resolvable:$true] %s1479_s29 }
 0x41c   : > { %s1481_s19 = scalar_lea.hbm %s1480_s29, 8  ;;  %p1486_p3 = scmp.lt.s32.totalorder %s1480_s29, %s1891_s16 }
 0x41d   : > { %p1482_p0 = scmp.ne.s32.totalorder %s1480_s29, %s1481_s19 }
 0x41f   : > { %p1483_p1 = pnand %p1482_p0, %p1667_p5 }
 0x421   : > { %p1484_p2 = pneg %p1483_p1 }
 0x475   : > { %v655_v59 = vpop.xlane.xlu1 %654 }
 0x476   : > { %vm656_vm10 = vcmp.eq.f32.partialorder %v653_v56, %v655_v59  ;;  %v661_v4 = vcvt.f32.s32 %v655_v59 }
 0x477   : > { %v657_v61 = vsel %vm656_vm10, %v652_v60, inf }
 0x478   : > { %658 = vmin.xlane.f32.xlu2 %v657_v61  ;;  %v662_v6 = vshll.u32 %v661_v4, 16  ;;  %v1274_v4 = vld [vmem:[%s1887_s12] sm:$0xff] }
 0x48d   : > { %v767_v62 = vpop.permute.xlu1 %766 }
 0x48e   : > { %1215 = vmatmul.msk.bf16.vlgmr.msra.gmra.mxu3 %vm726_vm9, %v767_v62 }
 0x48f   : > { %1019 = vmatpush.bf16.msra.mxu3 %v1274_v4 }
 0x490   : > { %816 = vrot.lane.b32.xlu2 %v718_v55, %s1541_s28 }
 0x4eb   : > { %v659_v5 = vpop.xlane.xlu2 %658 }
 0x4ec   : > { %v660_v8 = vcvt.f32.s32 %v659_v5 }
 0x4ee   : > { %v663_v9 = vadd.s32 %v662_v6, %v660_v8 }
 0x4f0   : > { %vm664_vm12 = vcmp.eq.s32.totalorder %v1730_v10, %v663_v9 }
 0x4f1   : > { %vm665_vm13 = vmor %vm642_vm11, %vm664_vm12 }
 0x4f2   : > { %v669_v13 = vsel %vm665_vm13, %v1356_v12, 0.0 }
 0x4f3   : > { %v817_v14 = vpop.permute.xlu2 %816  ;;  %v670_v7 = vsel %vm598_vm1, %v669_v13, 0.0 }
 0x4f4   : > { %671 = vadd.xlane.f32.xlu0 %v670_v7  ;;  %1221 = vmatmul.msk.bf16.vlgmr.msrb.gmra.mxu0 %vm726_vm9, %v817_v14 }
 0x511   : > { %v786_v16 = vpop.f32.mrf.mxu3 }
 0x512   : > { %v787_v17 = vadd.f32 %v786_v16, %v764_v15 }
 0x514   : > { %v1216_v10 = vmul.f32 -1.442695, %v787_v17 }
 0x516   : > { %1357 = vpow2.f32 %v1216_v10 }
 0x519   : > { %v788_v19 = vpop.f32.mrf.mxu3 }
 0x51c   : > { %v1358_v20 = vpop.eup %1357 }
 0x51d   : > { %v793_v21 = vadd.f32 1.0, %v1358_v20 }
 0x51f   : > { %1359 = vrcp.f32 %v793_v21  ;;  %v805_v24 = vand.u32 2147483648, %v793_v21  ;;  %vm799_vm15 = vweird.f32 %v793_v21  ;;  %v803_v26 = vand.u32 2147483647, %v793_v21 }
 0x521   : > { %v806_v28 = vor.u32 1.1754944e-38, %v805_v24  ;;  %vm804_vm3 = vcmp.eq.f32.partialorder %v803_v26, 8.507059e+37  ;;  %v1352_v24 = vld [vmem:[#allocation7] ss:$0 sm:$0xff] }
 0x525   : > { %v1360_v22 = vpop.eup %1359 }
 0x526   : > { %v795_v23 = vmul.f32 %v1360_v22, %v793_v21  ;;  %vm800_vm1 = vweird.f32 %v1360_v22 }
 0x527   : > { %vm801_vm2 = vmor %vm799_vm15, %vm800_vm1 }
 0x528   : > { %v796_v25 = vsub.f32 1.0, %v795_v23 }
 0x52a   : > { %v797_v27 = vmul.f32 %v1360_v22, %v796_v25 }
 0x52c   : > { %v798_v29 = vadd.f32 %v1360_v22, %v797_v27 }
 0x52e   : > { %v802_v30 = vsel %vm801_vm2, %v1360_v22, %v798_v29 }
 0x52f   : > { %v807_v31 = vsel %vm804_vm3, %v806_v28, %v802_v30 }
 0x530   : > { %v809_v32 = vmul.f32 %v807_v31, %v787_v17 }
 0x532   : > { %811 = vrot.lane.b32.xlu0 %v809_v32, %s1542_s27  ;;  %v1353_v32 = vld [vmem:[%s1888_s13] ss:$0 sm:$0xff] }
 0x567   : > { %v672_v36 = vpop.xlane.xlu0 %671 }
 0x568   : > { %1361 = vrcp.f32 %v672_v36 }
 0x56e   : > { %v1362_v37 = vpop.eup %1361 }
 0x56f   : > { %v674_v40 = vmul.f32 %v1362_v37, %v669_v13 }
 0x571   : > { %v836_v41 = vpop.f32.mrf.mxu0  ;;  %1224 = vmatmul.msk.f32.vlgmr.msrb.gmra.mxu2 %vm868_vm4, %v674_v40  ;;  %1226 = vmatmul.msk.f32.vlgmr.msrb.gmra.mxu3 %vm868_vm4, %v674_v40 }
 0x572   : > { %v837_v42 = vadd.f32 %v836_v41, %v815_v39 }
 0x574   : > { %v1222_v43 = vmul.f32 -1.442695, %v837_v42 }
 0x576   : > { %1363 = vpow2.f32 %v1222_v43 }
 0x579   : > { %1248 = vmatmul.msk.bf16.vlgmr.msra.gmra.mxu2 %vm572_vm0, %v1755_v38  ;;  %v838_v44 = vpop.f32.mrf.mxu0  ;;  %v719_v38 = vperm.slane %v1795_v11, 0 }
 0x57b   : > { %v740_v59 = vadd.f32 %v1780_v0, %v719_v38  ;;  %v1269_v0 = vld [vmem:[%s1882_s7] sm:$0xff] }
 0x57c   : > { %v1364_v45 = vpop.eup %1363  ;;  %957 = vmatpush.bf16.msrb.mxu1 %v1269_v0 }
 0x57d   : > { %v843_v46 = vadd.f32 1.0, %v1364_v45  ;;  %v1210_v60 = vmul.f32 -1.442695, %v740_v59 }
 0x57f   : > { %1365 = vrcp.f32 %v843_v46  ;;  %v855_v49 = vand.u32 2147483648, %v843_v46  ;;  %vm849_vm5 = vweird.f32 %v843_v46  ;;  %v853_v52 = vand.u32 2147483647, %v843_v46 }
 0x580   : > { %1367 = vpow2.f32 %v1210_v60 }
 0x581   : > { %v856_v54 = vor.u32 1.1754944e-38, %v855_v49  ;;  %vm854_vm8 = vcmp.eq.f32.partialorder %v853_v52, 8.507059e+37 }
 0x585   : > { %v1366_v47 = vpop.eup %1365 }
 0x586   : > { %v845_v48 = vmul.f32 %v1366_v47, %v843_v46  ;;  %vm850_vm6 = vweird.f32 %v1366_v47  ;;  %v1368_v61 = vpop.eup %1367 }
 0x587   : > { %vm851_vm7 = vmor %vm849_vm5, %vm850_vm6  ;;  %v746_v62 = vadd.f32 1.0, %v1368_v61 }
 0x588   : > { %v846_v51 = vsub.f32 1.0, %v845_v48 }
 0x589   : > { %1369 = vrcp.f32 %v746_v62  ;;  %vm752_vm10 = vweird.f32 %v746_v62  ;;  %v758_v8 = vand.u32 2147483648, %v746_v62  ;;  %v756_v12 = vand.u32 2147483647, %v746_v62 }
 0x58a   : > { %v847_v53 = vmul.f32 %v1366_v47, %v846_v51 }
 0x58b   : > { %v759_v13 = vor.u32 1.1754944e-38, %v758_v8  ;;  %vm757_vm13 = vcmp.eq.f32.partialorder %v756_v12, 8.507059e+37 }
 0x58c   : > { %v848_v55 = vadd.f32 %v1366_v47, %v847_v53 }
 0x58e   : > { %v852_v56 = vsel %vm851_vm7, %v1366_v47, %v848_v55  ;;  %v1354_v55 = vld [vmem:[%s1890_s15] ss:$0 sm:$0xff] }
 0x58f   : > { %v857_v57 = vsel %vm854_vm8, %v856_v54, %v852_v56  ;;  %v1370_v2 = vpop.eup %1369 }
 0x590   : > { %v859_v58 = vmul.f32 %v857_v57, %v837_v42  ;;  %v748_v3 = vmul.f32 %v1370_v2, %v746_v62  ;;  %vm753_vm11 = vweird.f32 %v1370_v2 }
 0x591   : > { %vm754_vm12 = vmor %vm752_vm10, %vm753_vm11 }
 0x592   : > { %861 = vrot.lane.b32.xlu2 %v859_v58, %s1543_s20  ;;  %v749_v5 = vsub.f32 1.0, %v748_v3  ;;  %s554_s20 = sand.u32 1, %s1527_s22  }
 0x593   : > { %s1193_s28 = sshll.u32 %s554_s20, 3  ;;  %s1078_s25 = scalar_lea.sflag [#allocation4], %s554_s20 }
 0x594   : > { %v750_v6 = vmul.f32 %v1370_v2, %v749_v5  ;;  %s556_s17 = scalar_lea.vmem [#allocation8], %s1193_s28  ;;  %s1485_s28 = scalar_lea.hbm %s1891_s16, 16 }
 0x595   : > { %s1090_s18 = sshll.u32 %s556_s17, 4  ;;  %p1487_p4 = scmp.lt.s32.totalorder %s1485_s28, %s1481_s19  ;;  %s1091_s18 = int_to_ptr.vmem [resolvable:$true] %s1090_s18 }
 0x596   : > { %v751_v9 = vadd.f32 %v1370_v2, %v750_v6 }
 0x597   : > { %p1488_p7 = por %p1487_p4, %p1486_p3 }
 0x598   : > { %v755_v14 = vsel %vm754_vm12, %v1370_v2, %v751_v9 }
 0x599   : > { %v760_v7 = vsel %vm757_vm13, %v759_v13, %v755_v14  ;;  %p1489_p8 = pnand %p1488_p7, %p1484_p2 }
 0x59a   : > { %v762_v15 = vmul.f32 %v760_v7, %v740_v59 }
 0x59c   : > { %v763_v10 = vmul.f32 %v762_v15, %v1763_v50 }
 0x5a4   : > { %v812_v11 = vpop.permute.xlu0 %811 }
 0x5a5   : > { %v814_v17 = vmul.f32 %v812_v11, %v1763_v50 }
 0x5a7   : > { %v865_v19 = vsel %vm726_vm9, %v763_v10, %v814_v17 }
 0x5ec   : > { %v862_v16 = vpop.permute.xlu2 %861 }
 0x5ed   : > { %v864_v18 = vmul.f32 %v862_v16, %v1763_v50 }
 0x5ef   : > { %v866_v20 = vsel %vm572_vm0, %v865_v19, %v864_v18 }
 0x5f4   : > { %v893_v21 = vpop.f32.mrf.mxu2  ;;  %v925_v29 = vpop.f32.mrf.mxu3 }
 0x5f5   : > { %v896_v22 = vmul.f32 %v893_v21, %v866_v20 }
 0x5f7   : > { %v897_v23 = vpack.c.bf16 %v896_v22, %v896_v22 }
 0x5f9   : > { %1239 = vmatmul.msk.bf16.vlgmr.msrb.gmra.mxu1 %vm946_vm14, %v897_v23 }
 0x5fc   : > { %v992_v25 = vpop.f32.mrf.mxu2 }
 0x5fd   : > { %v993_v26 = vadd.f32 %v1352_v24, %v992_v25 }
 0x5ff   : > { %v998_v27 = vpack.c.bf16 %v993_v26, %v993_v26 }
 0x601   : > { %1253 = vmatmul.msk.bf16.vlgmr.msra.gmra.mxu3 %vm726_vm9, %v998_v27 }
 0x604   : > { %v994_v28 = vpop.f32.mrf.mxu2 }
 0x676   : > { %v959_v30 = vpop.f32.mrf.mxu1 }
 0x677   : > { %v960_v31 = vadd.f32 %v959_v30, %v925_v29 }
 0x67e   : > { %v961_v50 = vpop.f32.mrf.mxu1 }
 0x684   : > { %v1021_v33 = vpop.f32.mrf.mxu3 }
 0x685   : > { %v1022_v35 = vadd.f32 %v1353_v32, %v1021_v33 }
 0x687   : > { %v1254_v36 = vmul.f32 -1.442695, %v1022_v35 }
 0x689   : > { %1371 = vpow2.f32 %v1254_v36 }
 0x68c   : > { %v1023_v37 = vpop.f32.mrf.mxu3 }
 0x68f   : > { %v1372_v39 = vpop.eup %1371 }
 0x690   : > { %v1028_v40 = vadd.f32 1.0, %v1372_v39 }
 0x692   : > { %1373 = vrcp.f32 %v1028_v40  ;;  %v1040_v44 = vand.u32 2147483648, %v1028_v40  ;;  %v1038_v46 = vand.u32 2147483647, %v1028_v40  ;;  %vm1034_vm1 = vweird.f32 %v1028_v40 }
 0x694   : > { %v1041_v48 = vor.u32 1.1754944e-38, %v1040_v44  ;;  %vm1039_vm3 = vcmp.eq.f32.partialorder %v1038_v46, 8.507059e+37 }
 0x698   : > { %v1374_v41 = vpop.eup %1373 }
 0x699   : > { %v1030_v42 = vmul.f32 %v1374_v41, %v1028_v40  ;;  %vm1035_vm15 = vweird.f32 %v1374_v41 }
 0x69a   : > { %vm1036_vm2 = vmor %vm1034_vm1, %vm1035_vm15 }
 0x69b   : > { %v1031_v43 = vsub.f32 1.0, %v1030_v42 }
 0x69d   : > { %v1032_v45 = vmul.f32 %v1374_v41, %v1031_v43 }
 0x69f   : > { %v1033_v47 = vadd.f32 %v1374_v41, %v1032_v45 }
 0x6a1   : > { %v1037_v49 = vsel %vm1036_vm2, %v1374_v41, %v1033_v47 }
 0x6a2   : > { %v1042_v51 = vsel %vm1039_vm3, %v1041_v48, %v1037_v49 }
 0x6a3   : > { %v1044_v52 = vmul.f32 %v1042_v51, %v1022_v35 }
 0x6a5   : > { %v1045_v53 = vmul.f32 %v1044_v52, %v993_v26 }
 0x6a7   : > { %v1046_v54 = vpack.c.bf16 %v1045_v53, %v1045_v53 }
 0x6a9   : > { %1259 = vmatmul.msk.bf16.vlgmr.msra.gmra.mxu0 %vm726_vm9, %v1046_v54 }
 0x726   : > { %v1071_v56 = vpop.f32.mrf.mxu0 }
 0x727   : > { %v1072_v57 = vadd.f32 %v1354_v55, %v1071_v56 }
 0x729   : > { %v1075_v58 = vadd.f32 %v1072_v57, %v960_v31 }
 0x72b   : > { %1076 = vst.msk [vmem:[%s556_s17] sm:$0xff] %vm572_vm0, %v1075_v58 }
 0x72c   : > { %1492 = shalt.err (!%p1489_p8)
}
 0x72d   : > { %1288 = dma.vmem_to_hbm [thread:$0]  (%p1667_p5), %s1091_s18, 128, %s1093_s26, %s1078_s25  }
 0x72e   : > { %v1073_v38 = vpop.f32.mrf.mxu0 }
 0x72f PF: > { %s1911_s20 = sld [smem:[#allocation14_spill]] }
 0x730   : > { %s1912_s27 = sld [smem:[#allocation12_spill]] }
 0x735   : > { %p1310_p9 = scmp.ge.s32.totalorder %s1911_s20, 2 }
 0x736   : > { %s1104_s17 = sand.u32 1, %s1912_s27  }
 0x737   : > { %p1301_p10 = pnand %p1310_p9, %p1671_p6  ;;  %s1105_s23 = scalar_lea.sflag [#allocation4], %s1104_s17 }
 0x739   : > { %p1302_p11 = pneg %p1301_p10 }
 0x73b   : > { %1518 = dma.done.wait (%p1302_p11), %s1105_s23, 128  }
 0x73c   : > { %1520 = vsyncadd (%p1302_p11), %s1105_s23, 4294967168  ;;  %s1914_s24 = sld [smem:[#allocation15_spill]]  ;;  %s1917_s21 = smov %s1527_s22 }
 0x73d   : > { %s1915_s29 = sld [smem:[#allocation13_spill]] }
 0x73e   : > { %s1916_s23 = sld [smem:[#allocation16_spill]] }
 0x742   : > { %p28_p12 = scmp.ge.s32.totalorder %s1914_s24, 4  }
 0x743   : > { %s1918_s22 = smov %s1915_s29 }
 0x744   :  { %30 = sbr.rel (!%p28_p12) target bundleno = 8 (0x8), region = 132 }
 0x749   :  { %1111 = vsyncpa [#allocation3], 1 }
 0x74a   :  { %1113 = vsyncpa [#allocation3 + $0x1], 1 }
 0x74b   :  { %1114 = vsyncpa [#allocation6], 1 }
 0x74c   :  { %1115 = vsyncpa [#allocation4], 1 }
 0x74d   :  { %1117 = vsyncpa [#allocation4 + $0x1], 1 }

// kernel: tpu_custom_call.1
= control target key start
LH: loop header
LB: loop body
LE: loop exit
PB: predicated region body
PF: predicated region fallthrough
CT: control target
= control target key end

     0   :  { %s1875_s0 = inlined_call_operand.vmem [shape: f32[16,32], index: 0, kind: input, shape index: {}]   ;;  %s1876_s1 = inlined_call_operand.vmem [shape: f32[32,4], index: 1, kind: input, shape index: {}]   ;;  %s1877_s2 = inlined_call_operand.vmem [shape: f32[1,4], index: 2, kind: input, shape index: {}]   ;;  %s1878_s3 = inlined_call_operand.vmem [shape: bf16[32,48], index: 3, kind: input, shape index: {}]   ;;  %s1879_s4 = inlined_call_operand.hbm [shape: f32[1,48], index: 4, kind: input, shape index: {}]   ;;  %s1880_s5 = inlined_call_operand.vmem [shape: bf16[3,16,16], index: 5, kind: input, shape index: {}]   ;;  %s1881_s6 = inlined_call_operand.vmem [shape: f32[3,16], index: 6, kind: input, shape index: {}]   ;;  %s1882_s7 = inlined_call_operand.vmem [shape: bf16[48,32], index: 7, kind: input, shape index: {}]   ;;  %s1883_s8 = inlined_call_operand.vmem [shape: f32[3,32], index: 8, kind: input, shape index: {}]   ;;  %s1884_s9 = inlined_call_operand.hbm [shape: f32[3,48], index: 9, kind: input, shape index: {}]   ;;  %s1885_s10 = inlined_call_operand.vmem [shape: bf16[32,16], index: 10, kind: input, shape index: {}]   ;;  %s1886_s11 = inlined_call_operand.hbm [shape: f32[1,16], index: 11, kind: input, shape index: {}]   ;;  %s1887_s12 = inlined_call_operand.vmem [shape: bf16[16,16], index: 12, kind: input, shape index: {}]   ;;  %s1888_s13 = inlined_call_operand.vmem [shape: f32[1,16], index: 13, kind: input, shape index: {}]   ;;  %s1889_s14 = inlined_call_operand.vmem [shape: bf16[16,32], index: 14, kind: input, shape index: {}]   ;;  %s1890_s15 = inlined_call_operand.vmem [shape: f32[1,32], index: 15, kind: input, shape index: {}]   ;;  %s1891_s16 = inlined_call_operand.hbm [shape: f32[16,32], index: 16, kind: output, shape index: {}]  }
   0x1   :  { %1898 = sst [smem:[#allocation18_spill]] %s1875_s0 }
   0x2   :  { %1899 = sst [smem:[#allocation19_spill]] %s1884_s9 }
   0x3   :  { %21 = vsyncpa [#allocation3], 0 }
   0x4   :  { %22 = vsyncpa [#allocation6], 0 }
   0x5   :  { %23 = vsyncpa [#allocation4], 0 }
   0x6   :  { %25 = vsyncpa [#allocation4 + $0x1], 0  ;;  %s1629_s21 = smov 0   ;;  %s1631_s22 = smov 0  }
   0x7   :  { %s1633_s23 = smov 0   ;;  %s1635_s24 = smov 0  }
   0x8 LB: > { %1900 = sst [smem:[#allocation12_spill]] %s1523_s21  ;;  %s1650_s25 = sadd.s32 4294967295, %s1535_s24   ;;  %s1535_s24 = sphi %s1635_s24, %s1914_s24   ;;  %s1531_s23 = sphi %s1633_s23, %s1916_s23   ;;  %s1527_s22 = sphi %s1631_s22, %s1918_s22   ;;  %s1523_s21 = sphi %s1629_s21, %s1917_s21  }
   0x9   : > { %1901 = sst [smem:[#allocation13_spill]] %s1531_s23  ;;  %s1183_s26 = sadd.s32 4294967294, %s1535_s24  }
   0xa   : > { %1902 = sst [smem:[#allocation14_spill]] %s1535_s24  ;;  %s1654_s27 = sadd.s32 1, %s1535_s24  }
   0xb   : > { %1903 = sst [smem:[#allocation15_spill]] %s1654_s27  ;;  %s379_s28 = sadd.s32 1, %s1531_s23 }
   0xc   : > { %s376_s29 = ssub.s32 %s1535_s24, %s1654_s27  ;;  %p389_p0 = scmp.ne.s32.totalorder %s1531_s23, %s1527_s22 }
   0xd   : > { %p377_p1 = scmp.eq.s32.totalorder %s376_s29, 0  ;;  %p390_p2 = scmp.eq.s32.totalorder %s1650_s25, 1 }
   0xe   : > { %p395_p3 = scmp.ne.s32.totalorder %s1527_s22, %s1523_s21  ;;  %p396_p4 = scmp.eq.s32.totalorder %s1183_s26, 1 }
   0xf   : > { %s1665_s30 = scalar_select %p377_p1, %s1531_s23, %s379_s28  }
  0x10   : > { %p1667_p5 = por %p390_p2, %p389_p0  ;;  %p1671_p6 = por %p396_p4, %p395_p3 }
  0x11   : > { %1904 = sst [smem:[#allocation16_spill]] %s1665_s30  ;;  %p1184_p7 = scmp.ge.s32.totalorder %s1535_s24, 1 }
  0x12   : > { %s1906_s17 = scalar_select %p1671_p6, 1, 0 }
  0x13   : > { %p403_p8 = scmp.lt.s32.totalorder %s1535_s24, 3  ;;  %p1304_p9 = scmp.eq.s32.totalorder %s1650_s25, 0 }
  0x14   : > { %1907 = sst [smem:[#allocation17_spill]] %s1906_s17  ;;  %s1537_s28 = smov [#allocation5]  }
  0x15   : > { %p1678_p10 = pnand %p1184_p7, %p403_p8  ;;  %s1909_s9 = sld [smem:[#allocation19_spill]] }
  0x16   : > { %s450_s29 = sshll.u32 %s1537_s28, 4  ;;  %s424_s27 = sshll.u32 %s1879_s4, 4  ;;  %s451_s29 = int_to_ptr.vmem [resolvable:$true] %s450_s29  ;;  %s425_s27 = int_to_ptr.hbm [resolvable:$true] %s424_s27 }
  0x17   : > { %p1290_p11 = pneg %p1678_p10  ;;  %s463_s24 = sshll.u32 %s1886_s11, 4  ;;  %s464_s24 = int_to_ptr.hbm [resolvable:$true] %s463_s24 }
  0x18   : > { %s1538_s19 = smov [#allocation2]  }
  0x19   : > { %p1291_p12 = pnand %p1304_p9, %p1290_p11  ;;  %s426_s20 = sshll.u32 %s1538_s19, 4  ;;  %s427_s20 = int_to_ptr.vmem [resolvable:$true] %s426_s20 }
  0x1b   : > { %s448_s26 = sshll.u32 %s1909_s9, 4  ;;  %s1539_s9 = smov [#allocation7]   ;;  %s449_s26 = int_to_ptr.hbm [resolvable:$true] %s448_s26 }
  0x1c   : > { %1296 = dma.hbm_to_vmem [thread:$0]  (!%p1291_p12), %s449_s26, 64, %s451_s29, [#allocation6]  }
  0x1d   : > { %1293 = dma.hbm_to_vmem [thread:$0]  (!%p1291_p12), %s425_s27, 16, %s427_s20, [#allocation3]  }
  0x1e   : > { %s465_s28 = sshll.u32 %s1539_s9, 4  ;;  %497 = sbr.rel (%p1678_p10) target bundleno = 1839 (0x72f), region = 84  ;;  %s466_s28 = int_to_ptr.vmem [resolvable:$true] %s465_s28 }
  0x1f   : > { %1299 = dma.hbm_to_vmem [thread:$0]  (!%p1291_p12), %s464_s24, 16, %s466_s28, [#allocation6]  }
  0x23   : > { %1510 = dma.done.wait (%p1304_p9), [#allocation3], 16  }
  0x24   : > { %1512 = vsyncadd (%p1304_p9), [#allocation3], 4294967280 }
  0x25   : > { %1514 = dma.done.wait (%p1304_p9), [#allocation6], 80  }
  0x26   : > { %1516 = vsyncadd (%p1304_p9), [#allocation6], 4294967216  ;;  %p557_p13 = scmp.lt.s32.totalorder %s1650_s25, 1  ;;  %v567_v0 = vld [vmem:[%s1876_s1 + $0x18] sm:$0xff]  ;;  %v566_v1 = vld [vmem:[%s1876_s1 + $0x10] sm:$0xff]  ;;  %s1910_s19 = sld [smem:[#allocation18_spill]]  ;;  %v596_v9 = vlaneseq }
  0x27   : > { %588 = vmatpush.msra.mxu0 %v567_v0  ;;  %v565_v2 = vld [vmem:[%s1876_s1 + $0x8] sm:$0xff]  ;;  %v564_v3 = vld [vmem:[%s1876_s1] sm:$0xff]  ;;  %vm572_vm0 = vcmask 261120   ;;  %vm598_vm1 = vcmask 31744   ;;  %vm726_vm9 = vcmask 130048   ;;  %s1540_s29 = smov 112  }
  0x28   : > { %s558_s9 = scalar_select %p557_p13, %s1650_s25, 1  ;;  %v1350_v5 = vld [vmem:[%s1877_s2] ss:$0 sm:$0xff]  ;;  %v1730_v10 = vand.u32 127, %v596_v9  ;;  %v1265_v36 = vld [vmem:[%s1878_s3 + $0x8] sm:$0xff]  ;;  %v1268_v63 = vld [vmem:[%s1880_s5 + $0x10] sm:$0xff] }
  0x29   : > { %589 = vmatpush.msra.mxu0 %v566_v1  ;;  %704 = vmatpush.bf16.msra.mxu1 %v1265_v36  ;;  %v1264_v37 = vld [vmem:[%s1878_s3] sm:$0xff]  ;;  %v1267_v57 = vld [vmem:[%s1880_s5 + $0x8] sm:$0xff]  ;;  %s1541_s28 = smov 96   ;;  %vm872_vm14 = vcmask 1042432   ;;  %s1542_s27 = smov 16  }
  0x2a   : > { %s1194_s21 = sshll.u32 %s558_s9, 3  ;;  %v1351_v48 = vld [vmem:[#allocation2] ss:$0 sm:$0xff]  ;;  %784 = vmatpush.bf16.msra.mxu3 %v1267_v57  ;;  %s1261_s9 = sshll.u32 %s1650_s25, 3 }
  0x2b   : > { %590 = vmatpush.msra.mxu0 %v565_v2  ;;  %v1266_v51 = vld [vmem:[%s1880_s5] sm:$0xff]  ;;  %s1088_s30 = scalar_lea.hbm %s1891_s16, %s1261_s9 }
  0x2c   : > { %s560_s20 = scalar_lea.vmem %s1910_s19, %s1194_s21  ;;  %737 = vmatpush.bf16.msra.mxu2 %v1266_v51  ;;  %s1092_s26 = sshll.u32 %s1088_s30, 4  ;;  %s1093_s26 = int_to_ptr.hbm [resolvable:$true] %s1092_s26 }
  0x2d   : > { %v562_v4 = vld [vmem:[%s560_s20] sm:$0xff]  ;;  %591 = vmatpush.msra.mxu0 %v564_v3  ;;  %705 = vmatpush.bf16.msra.mxu1 %v1264_v37  ;;  %s1543_s20 = smov 32  }
  0x2e   : > { %1195 = vmatmul.msk.f32.vlgmr.msra.gmra.mxu0 %vm572_vm0, %v562_v4  ;;  %v1755_v38 = vpack.c.bf16 %v562_v4, %v562_v4 }
  0x2f   : > { %834 = vmatpush.bf16.msrb.mxu0 %v1268_v63  ;;  %v1271_v63 = vld [vmem:[%s1882_s7 + $0x10] sm:$0xff] }
  0x30   : > { %1204 = vmatmul.msk.bf16.vlgmr.msra.gmra.mxu1 %vm572_vm0, %v1755_v38 }
  0x31   : > { %955 = vmatpush.bf16.msrb.mxu1 %v1271_v63 }
  0xab   : > { %v593_v6 = vpop.f32.mrf.mxu0 }
  0xac   : > { %v1726_v7 = vadd.f32 %v1350_v5, %v593_v6 }
  0xad   : > { %v707_v46 = vpop.f32.mrf.mxu1 }
  0xae   : > { %v599_v8 = vsel %vm598_vm1, %v1726_v7, -inf  ;;  %v1763_v50 = vadd.f32 %v1351_v48, %v707_v46 }
  0xaf   : > { %600 = vmax.xlane.f32.xlu0 %v599_v8 }
  0xb0   : > { %v718_v55 = vpack.c.bf16 %v1763_v50, %v1763_v50 }
  0xb2   : > { %1209 = vmatmul.msk.bf16.vlgmr.msra.gmra.mxu2 %vm726_vm9, %v718_v55 }
  0xb5   : > { %v709_v47 = vpop.f32.mrf.mxu1 }
 0x122   : > { %v1732_v11 = vpop.xlane.xlu0 %600 }
 0x123   : > { %vm602_vm2 = vcmp.eq.f32.partialorder %v1726_v7, %v1732_v11  ;;  %v666_v2 = vsub.f32 %v1726_v7, %v1732_v11  ;;  %v1795_v11 = vld [vmem:[%s1881_s6] sm:$0x7] }
 0x124   : > { %v603_v12 = vsel %vm602_vm2, %v1730_v10, 4 }
 0x125   : > { %v604_v13 = vsel %vm598_vm1, %v603_v12, 2147483647  ;;  %v667_v3 = vmul.f32 1.442695, %v666_v2 }
 0x126   : > { %v606_v14 = vshra.s32 %v604_v13, 16  ;;  %v605_v16 = vand.u32 65535, %v604_v13 }
 0x127   : > { %1355 = vpow2.f32 %v667_v3 }
 0x128   : > { %v608_v15 = vcvt.s32.f32 %v606_v14  ;;  %v607_v18 = vcvt.s32.f32 %v605_v16 }
 0x12a   : > { %609 = vmin.xlane.f32.xlu0 %v608_v15 }
 0x12d   : > { %v1356_v12 = vpop.eup %1355 }
 0x135   : > { %v1780_v0 = vpop.f32.mrf.mxu2 }
 0x13d   : > { %v741_v1 = vpop.f32.mrf.mxu2 }
 0x13e   : > { %v1270_v1 = vld [vmem:[%s1882_s7 + $0x8] sm:$0xff] }
 0x13f   : > { %956 = vmatpush.bf16.msrb.mxu1 %v1270_v1 }
 0x19d   : > { %v610_v17 = vpop.xlane.xlu0 %609 }
 0x19e   : > { %vm611_vm3 = vcmp.eq.f32.partialorder %v608_v15, %v610_v17  ;;  %v616_v20 = vcvt.f32.s32 %v610_v17  ;;  %v764_v15 = vperm.slane %v1795_v11, 1 }
 0x19f   : > { %v612_v19 = vsel %vm611_vm3, %v607_v18, inf  ;;  %v867_v18 = vld [vmem:[#allocation5] sm:$0x7] }
 0x1a0   : > { %613 = vmin.xlane.f32.xlu1 %v612_v19  ;;  %v617_v22 = vshll.u32 %v616_v20, 16  ;;  %1223 = vmatpush.msk.msrb.mxu2 %vm872_vm14, %v867_v18 }
 0x213   : > { %v614_v21 = vpop.xlane.xlu1 %613 }
 0x214   : > { %v615_v23 = vcvt.f32.s32 %v614_v21 }
 0x216   : > { %v1738_v24 = vadd.s32 %v617_v22, %v615_v23 }
 0x218   : > { %vm619_vm4 = vcmp.eq.s32.totalorder %v1730_v10, %v1738_v24 }
 0x219   : > { %v620_v25 = vsel %vm619_vm4, -inf, %v1726_v7 }
 0x21a   : > { %v621_v26 = vsel %vm598_vm1, %v620_v25, -inf }
 0x21b   : > { %622 = vmax.xlane.f32.xlu1 %v621_v26 }
 0x28e   : > { %v623_v27 = vpop.xlane.xlu1 %622 }
 0x28f   : > { %vm624_vm5 = vcmp.eq.f32.partialorder %v620_v25, %v623_v27 }
 0x290   : > { %v625_v28 = vsel %vm624_vm5, %v1730_v10, 4 }
 0x291   : > { %v626_v29 = vsel %vm598_vm1, %v625_v28, 2147483647 }
 0x292   : > { %v628_v30 = vshra.s32 %v626_v29, 16  ;;  %v627_v32 = vand.u32 65535, %v626_v29 }
 0x294   : > { %v630_v31 = vcvt.s32.f32 %v628_v30  ;;  %v629_v34 = vcvt.s32.f32 %v627_v32 }
 0x296   : > { %631 = vmin.xlane.f32.xlu2 %v630_v31 }
 0x309   : > { %v632_v33 = vpop.xlane.xlu2 %631 }
 0x30a   : > { %vm633_vm6 = vcmp.eq.f32.partialorder %v630_v31, %v632_v33  ;;  %v638_v39 = vcvt.f32.s32 %v632_v33  ;;  %v904_v33 = vld [vmem:[%s1883_s8] sm:$0x7] }
 0x30b   : > { %v634_v35 = vsel %vm633_vm6, %v629_v34, inf  ;;  %1225 = vmatpush.msk.msrb.mxu3 %vm872_vm14, %v904_v33  ;;  %v1273_v34 = vld [vmem:[%s1885_s10 + $0x8] sm:$0xff]  ;;  %vm946_vm14 = vcmask 392192  }
 0x30c   : > { %635 = vmin.xlane.f32.xlu2 %v634_v35  ;;  %v639_v41 = vshll.u32 %v638_v39, 16  ;;  %989 = vmatpush.bf16.msra.mxu2 %v1273_v34  ;;  %v1272_v35 = vld [vmem:[%s1885_s10] sm:$0xff]  ;;  %v815_v39 = vperm.slane %v1795_v11, 2 }
 0x30d   : > { %v1275_v34 = vld [vmem:[%s1889_s14] sm:$0xff] }
 0x30e   : > { %1069 = vmatpush.bf16.msra.mxu0 %v1275_v34 }
 0x310   : > { %990 = vmatpush.bf16.msra.mxu2 %v1272_v35 }
 0x37f   : > { %v636_v40 = vpop.xlane.xlu2 %635 }
 0x380   : > { %v637_v42 = vcvt.f32.s32 %v636_v40 }
 0x382   : > { %v640_v43 = vadd.s32 %v639_v41, %v637_v42 }
 0x384   : > { %vm641_vm7 = vcmp.eq.s32.totalorder %v1730_v10, %v640_v43 }
 0x385   : > { %v643_v44 = vsel %vm641_vm7, -inf, %v620_v25  ;;  %vm642_vm11 = vmor %vm619_vm4, %vm641_vm7  ;;  %vm868_vm4 = vcmask 23552  }
 0x386   : > { %v644_v45 = vsel %vm598_vm1, %v643_v44, -inf }
 0x387   : > { %645 = vmax.xlane.f32.xlu0 %v644_v45 }
 0x3fa   : > { %v646_v49 = vpop.xlane.xlu0 %645 }
 0x3fb   : > { %vm647_vm8 = vcmp.eq.f32.partialorder %v643_v44, %v646_v49 }
 0x3fc   : > { %v648_v52 = vsel %vm647_vm8, %v1730_v10, 4 }
 0x3fd   : > { %v649_v53 = vsel %vm598_vm1, %v648_v52, 2147483647 }
 0x3fe   : > { %v651_v54 = vshra.s32 %v649_v53, 16  ;;  %v650_v58 = vand.u32 65535, %v649_v53 }
 0x400   : > { %v653_v56 = vcvt.s32.f32 %v651_v54  ;;  %v652_v60 = vcvt.s32.f32 %v650_v58 }
 0x402   : > { %654 = vmin.xlane.f32.xlu1 %v653_v56 }
 0x41b   : > { %766 = vrot.lane.b32.xlu1 %v718_v55, %s1540_s29  ;;  %s1479_s29 = sshra.s32 %s1093_s26, 4  ;;  %s1480_s29 = int_to_ptr.hbm [resolvable:$true] %s1479_s29 }
 0x41c   : > { %s1481_s19 = scalar_lea.hbm %s1480_s29, 8  ;;  %p1486_p3 = scmp.lt.s32.totalorder %s1480_s29, %s1891_s16 }
 0x41d   : > { %p1482_p0 = scmp.ne.s32.totalorder %s1480_s29, %s1481_s19 }
 0x41f   : > { %p1483_p1 = pnand %p1482_p0, %p1667_p5 }
 0x421   : > { %p1484_p2 = pneg %p1483_p1 }
 0x475   : > { %v655_v59 = vpop.xlane.xlu1 %654 }
 0x476   : > { %vm656_vm10 = vcmp.eq.f32.partialorder %v653_v56, %v655_v59  ;;  %v661_v4 = vcvt.f32.s32 %v655_v59 }
 0x477   : > { %v657_v61 = vsel %vm656_vm10, %v652_v60, inf }
 0x478   : > { %658 = vmin.xlane.f32.xlu2 %v657_v61  ;;  %v662_v6 = vshll.u32 %v661_v4, 16  ;;  %v1274_v4 = vld [vmem:[%s1887_s12] sm:$0xff] }
 0x48d   : > { %v767_v62 = vpop.permute.xlu1 %766 }
 0x48e   : > { %1215 = vmatmul.msk.bf16.vlgmr.msra.gmra.mxu3 %vm726_vm9, %v767_v62 }
 0x48f   : > { %1019 = vmatpush.bf16.msra.mxu3 %v1274_v4 }
 0x490   : > { %816 = vrot.lane.b32.xlu2 %v718_v55, %s1541_s28 }
 0x4eb   : > { %v659_v5 = vpop.xlane.xlu2 %658 }
 0x4ec   : > { %v660_v8 = vcvt.f32.s32 %v659_v5 }
 0x4ee   : > { %v663_v9 = vadd.s32 %v662_v6, %v660_v8 }
 0x4f0   : > { %vm664_vm12 = vcmp.eq.s32.totalorder %v1730_v10, %v663_v9 }
 0x4f1   : > { %vm665_vm13 = vmor %vm642_vm11, %vm664_vm12 }
 0x4f2   : > { %v669_v13 = vsel %vm665_vm13, %v1356_v12, 0.0 }
 0x4f3   : > { %v817_v14 = vpop.permute.xlu2 %816  ;;  %v670_v7 = vsel %vm598_vm1, %v669_v13, 0.0 }
 0x4f4   : > { %671 = vadd.xlane.f32.xlu0 %v670_v7  ;;  %1221 = vmatmul.msk.bf16.vlgmr.msrb.gmra.mxu0 %vm726_vm9, %v817_v14 }
 0x511   : > { %v786_v16 = vpop.f32.mrf.mxu3 }
 0x512   : > { %v787_v17 = vadd.f32 %v786_v16, %v764_v15 }
 0x514   : > { %v1216_v10 = vmul.f32 -1.442695, %v787_v17 }
 0x516   : > { %1357 = vpow2.f32 %v1216_v10 }
 0x519   : > { %v788_v19 = vpop.f32.mrf.mxu3 }
 0x51c   : > { %v1358_v20 = vpop.eup %1357 }
 0x51d   : > { %v793_v21 = vadd.f32 1.0, %v1358_v20 }
 0x51f   : > { %1359 = vrcp.f32 %v793_v21  ;;  %v805_v24 = vand.u32 2147483648, %v793_v21  ;;  %vm799_vm15 = vweird.f32 %v793_v21  ;;  %v803_v26 = vand.u32 2147483647, %v793_v21 }
 0x521   : > { %v806_v28 = vor.u32 1.1754944e-38, %v805_v24  ;;  %vm804_vm3 = vcmp.eq.f32.partialorder %v803_v26, 8.507059e+37  ;;  %v1352_v24 = vld [vmem:[#allocation7] ss:$0 sm:$0xff] }
 0x525   : > { %v1360_v22 = vpop.eup %1359 }
 0x526   : > { %v795_v23 = vmul.f32 %v1360_v22, %v793_v21  ;;  %vm800_vm1 = vweird.f32 %v1360_v22 }
 0x527   : > { %vm801_vm2 = vmor %vm799_vm15, %vm800_vm1 }
 0x528   : > { %v796_v25 = vsub.f32 1.0, %v795_v23 }
 0x52a   : > { %v797_v27 = vmul.f32 %v1360_v22, %v796_v25 }
 0x52c   : > { %v798_v29 = vadd.f32 %v1360_v22, %v797_v27 }
 0x52e   : > { %v802_v30 = vsel %vm801_vm2, %v1360_v22, %v798_v29 }
 0x52f   : > { %v807_v31 = vsel %vm804_vm3, %v806_v28, %v802_v30 }
 0x530   : > { %v809_v32 = vmul.f32 %v807_v31, %v787_v17 }
 0x532   : > { %811 = vrot.lane.b32.xlu0 %v809_v32, %s1542_s27  ;;  %v1353_v32 = vld [vmem:[%s1888_s13] ss:$0 sm:$0xff] }
 0x567   : > { %v672_v36 = vpop.xlane.xlu0 %671 }
 0x568   : > { %1361 = vrcp.f32 %v672_v36 }
 0x56e   : > { %v1362_v37 = vpop.eup %1361 }
 0x56f   : > { %v674_v40 = vmul.f32 %v1362_v37, %v669_v13 }
 0x571   : > { %v836_v41 = vpop.f32.mrf.mxu0  ;;  %1224 = vmatmul.msk.f32.vlgmr.msrb.gmra.mxu2 %vm868_vm4, %v674_v40  ;;  %1226 = vmatmul.msk.f32.vlgmr.msrb.gmra.mxu3 %vm868_vm4, %v674_v40 }
 0x572   : > { %v837_v42 = vadd.f32 %v836_v41, %v815_v39 }
 0x574   : > { %v1222_v43 = vmul.f32 -1.442695, %v837_v42 }
 0x576   : > { %1363 = vpow2.f32 %v1222_v43 }
 0x579   : > { %1248 = vmatmul.msk.bf16.vlgmr.msra.gmra.mxu2 %vm572_vm0, %v1755_v38  ;;  %v838_v44 = vpop.f32.mrf.mxu0  ;;  %v719_v38 = vperm.slane %v1795_v11, 0 }
 0x57b   : > { %v740_v59 = vadd.f32 %v1780_v0, %v719_v38  ;;  %v1269_v0 = vld [vmem:[%s1882_s7] sm:$0xff] }
 0x57c   : > { %v1364_v45 = vpop.eup %1363  ;;  %957 = vmatpush.bf16.msrb.mxu1 %v1269_v0 }
 0x57d   : > { %v843_v46 = vadd.f32 1.0, %v1364_v45  ;;  %v1210_v60 = vmul.f32 -1.442695, %v740_v59 }
 0x57f   : > { %1365 = vrcp.f32 %v843_v46  ;;  %v855_v49 = vand.u32 2147483648, %v843_v46  ;;  %vm849_vm5 = vweird.f32 %v843_v46  ;;  %v853_v52 = vand.u32 2147483647, %v843_v46 }
 0x580   : > { %1367 = vpow2.f32 %v1210_v60 }
 0x581   : > { %v856_v54 = vor.u32 1.1754944e-38, %v855_v49  ;;  %vm854_vm8 = vcmp.eq.f32.partialorder %v853_v52, 8.507059e+37 }
 0x585   : > { %v1366_v47 = vpop.eup %1365 }
 0x586   : > { %v845_v48 = vmul.f32 %v1366_v47, %v843_v46  ;;  %vm850_vm6 = vweird.f32 %v1366_v47  ;;  %v1368_v61 = vpop.eup %1367 }
 0x587   : > { %vm851_vm7 = vmor %vm849_vm5, %vm850_vm6  ;;  %v746_v62 = vadd.f32 1.0, %v1368_v61 }
 0x588   : > { %v846_v51 = vsub.f32 1.0, %v845_v48 }
 0x589   : > { %1369 = vrcp.f32 %v746_v62  ;;  %vm752_vm10 = vweird.f32 %v746_v62  ;;  %v758_v8 = vand.u32 2147483648, %v746_v62  ;;  %v756_v12 = vand.u32 2147483647, %v746_v62 }
 0x58a   : > { %v847_v53 = vmul.f32 %v1366_v47, %v846_v51 }
 0x58b   : > { %v759_v13 = vor.u32 1.1754944e-38, %v758_v8  ;;  %vm757_vm13 = vcmp.eq.f32.partialorder %v756_v12, 8.507059e+37 }
 0x58c   : > { %v848_v55 = vadd.f32 %v1366_v47, %v847_v53 }
 0x58e   : > { %v852_v56 = vsel %vm851_vm7, %v1366_v47, %v848_v55  ;;  %v1354_v55 = vld [vmem:[%s1890_s15] ss:$0 sm:$0xff] }
 0x58f   : > { %v857_v57 = vsel %vm854_vm8, %v856_v54, %v852_v56  ;;  %v1370_v2 = vpop.eup %1369 }
 0x590   : > { %v859_v58 = vmul.f32 %v857_v57, %v837_v42  ;;  %v748_v3 = vmul.f32 %v1370_v2, %v746_v62  ;;  %vm753_vm11 = vweird.f32 %v1370_v2 }
 0x591   : > { %vm754_vm12 = vmor %vm752_vm10, %vm753_vm11 }
 0x592   : > { %861 = vrot.lane.b32.xlu2 %v859_v58, %s1543_s20  ;;  %v749_v5 = vsub.f32 1.0, %v748_v3  ;;  %s554_s20 = sand.u32 1, %s1527_s22  }
 0x593   : > { %s1193_s28 = sshll.u32 %s554_s20, 3  ;;  %s1078_s25 = scalar_lea.sflag [#allocation4], %s554_s20 }
 0x594   : > { %v750_v6 = vmul.f32 %v1370_v2, %v749_v5  ;;  %s556_s17 = scalar_lea.vmem [#allocation8], %s1193_s28  ;;  %s1485_s28 = scalar_lea.hbm %s1891_s16, 16 }
 0x595   : > { %s1090_s18 = sshll.u32 %s556_s17, 4  ;;  %p1487_p4 = scmp.lt.s32.totalorder %s1485_s28, %s1481_s19  ;;  %s1091_s18 = int_to_ptr.vmem [resolvable:$true] %s1090_s18 }
 0x596   : > { %v751_v9 = vadd.f32 %v1370_v2, %v750_v6 }
 0x597   : > { %p1488_p7 = por %p1487_p4, %p1486_p3 }
 0x598   : > { %v755_v14 = vsel %vm754_vm12, %v1370_v2, %v751_v9 }
 0x599   : > { %v760_v7 = vsel %vm757_vm13, %v759_v13, %v755_v14  ;;  %p1489_p8 = pnand %p1488_p7, %p1484_p2 }
 0x59a   : > { %v762_v15 = vmul.f32 %v760_v7, %v740_v59 }
 0x59c   : > { %v763_v10 = vmul.f32 %v762_v15, %v1763_v50 }
 0x5a4   : > { %v812_v11 = vpop.permute.xlu0 %811 }
 0x5a5   : > { %v814_v17 = vmul.f32 %v812_v11, %v1763_v50 }
 0x5a7   : > { %v865_v19 = vsel %vm726_vm9, %v763_v10, %v814_v17 }
 0x5ec   : > { %v862_v16 = vpop.permute.xlu2 %861 }
 0x5ed   : > { %v864_v18 = vmul.f32 %v862_v16, %v1763_v50 }
 0x5ef   : > { %v866_v20 = vsel %vm572_vm0, %v865_v19, %v864_v18 }
 0x5f4   : > { %v893_v21 = vpop.f32.mrf.mxu2  ;;  %v925_v29 = vpop.f32.mrf.mxu3 }
 0x5f5   : > { %v896_v22 = vmul.f32 %v893_v21, %v866_v20 }
 0x5f7   : > { %v897_v23 = vpack.c.bf16 %v896_v22, %v896_v22 }
 0x5f9   : > { %1239 = vmatmul.msk.bf16.vlgmr.msrb.gmra.mxu1 %vm946_vm14, %v897_v23 }
 0x5fc   : > { %v992_v25 = vpop.f32.mrf.mxu2 }
 0x5fd   : > { %v993_v26 = vadd.f32 %v1352_v24, %v992_v25 }
 0x5ff   : > { %v998_v27 = vpack.c.bf16 %v993_v26, %v993_v26 }
 0x601   : > { %1253 = vmatmul.msk.bf16.vlgmr.msra.gmra.mxu3 %vm726_vm9, %v998_v27 }
 0x604   : > { %v994_v28 = vpop.f32.mrf.mxu2 }
 0x676   : > { %v959_v30 = vpop.f32.mrf.mxu1 }
 0x677   : > { %v960_v31 = vadd.f32 %v959_v30, %v925_v29 }
 0x67e   : > { %v961_v50 = vpop.f32.mrf.mxu1 }
 0x684   : > { %v1021_v33 = vpop.f32.mrf.mxu3 }
 0x685   : > { %v1022_v35 = vadd.f32 %v1353_v32, %v1021_v33 }
 0x687   : > { %v1254_v36 = vmul.f32 -1.442695, %v1022_v35 }
 0x689   : > { %1371 = vpow2.f32 %v1254_v36 }
 0x68c   : > { %v1023_v37 = vpop.f32.mrf.mxu3 }
 0x68f   : > { %v1372_v39 = vpop.eup %1371 }
 0x690   : > { %v1028_v40 = vadd.f32 1.0, %v1372_v39 }
 0x692   : > { %1373 = vrcp.f32 %v1028_v40  ;;  %v1040_v44 = vand.u32 2147483648, %v1028_v40  ;;  %v1038_v46 = vand.u32 2147483647, %v1028_v40  ;;  %vm1034_vm1 = vweird.f32 %v1028_v40 }
 0x694   : > { %v1041_v48 = vor.u32 1.1754944e-38, %v1040_v44  ;;  %vm1039_vm3 = vcmp.eq.f32.partialorder %v1038_v46, 8.507059e+37 }
 0x698   : > { %v1374_v41 = vpop.eup %1373 }
 0x699   : > { %v1030_v42 = vmul.f32 %v1374_v41, %v1028_v40  ;;  %vm1035_vm15 = vweird.f32 %v1374_v41 }
 0x69a   : > { %vm1036_vm2 = vmor %vm1034_vm1, %vm1035_vm15 }
 0x69b   : > { %v1031_v43 = vsub.f32 1.0, %v1030_v42 }
 0x69d   : > { %v1032_v45 = vmul.f32 %v1374_v41, %v1031_v43 }
 0x69f   : > { %v1033_v47 = vadd.f32 %v1374_v41, %v1032_v45 }
 0x6a1   : > { %v1037_v49 = vsel %vm1036_vm2, %v1374_v41, %v1033_v47 }
 0x6a2   : > { %v1042_v51 = vsel %vm1039_vm3, %v1041_v48, %v1037_v49 }
 0x6a3   : > { %v1044_v52 = vmul.f32 %v1042_v51, %v1022_v35 }
 0x6a5   : > { %v1045_v53 = vmul.f32 %v1044_v52, %v993_v26 }
 0x6a7   : > { %v1046_v54 = vpack.c.bf16 %v1045_v53, %v1045_v53 }
 0x6a9   : > { %1259 = vmatmul.msk.bf16.vlgmr.msra.gmra.mxu0 %vm726_vm9, %v1046_v54 }
 0x726   : > { %v1071_v56 = vpop.f32.mrf.mxu0 }
 0x727   : > { %v1072_v57 = vadd.f32 %v1354_v55, %v1071_v56 }
 0x729   : > { %v1075_v58 = vadd.f32 %v1072_v57, %v960_v31 }
 0x72b   : > { %1076 = vst.msk [vmem:[%s556_s17] sm:$0xff] %vm572_vm0, %v1075_v58 }
 0x72c   : > { %1492 = shalt.err (!%p1489_p8)
}
 0x72d   : > { %1288 = dma.vmem_to_hbm [thread:$0]  (%p1667_p5), %s1091_s18, 128, %s1093_s26, %s1078_s25  }
 0x72e   : > { %v1073_v38 = vpop.f32.mrf.mxu0 }
 0x72f PF: > { %s1911_s20 = sld [smem:[#allocation14_spill]] }
 0x730   : > { %s1912_s27 = sld [smem:[#allocation12_spill]] }
 0x735   : > { %p1310_p9 = scmp.ge.s32.totalorder %s1911_s20, 2 }
 0x736   : > { %s1104_s17 = sand.u32 1, %s1912_s27  }
 0x737   : > { %p1301_p10 = pnand %p1310_p9, %p1671_p6  ;;  %s1105_s23 = scalar_lea.sflag [#allocation4], %s1104_s17 }
 0x739   : > { %p1302_p11 = pneg %p1301_p10 }
 0x73b   : > { %1518 = dma.done.wait (%p1302_p11), %s1105_s23, 128  }
 0x73c   : > { %1520 = vsyncadd (%p1302_p11), %s1105_s23, 4294967168  ;;  %s1914_s24 = sld [smem:[#allocation15_spill]]  ;;  %s1917_s21 = smov %s1527_s22 }
 0x73d   : > { %s1915_s29 = sld [smem:[#allocation13_spill]] }
 0x73e   : > { %s1916_s23 = sld [smem:[#allocation16_spill]] }
 0x742   : > { %p28_p12 = scmp.ge.s32.totalorder %s1914_s24, 4  }
 0x743   : > { %s1918_s22 = smov %s1915_s29 }
 0x744   :  { %30 = sbr.rel (!%p28_p12) target bundleno = 8 (0x8), region = 132 }
 0x749   :  { %1111 = vsyncpa [#allocation3], 1 }
 0x74a   :  { %1113 = vsyncpa [#allocation3 + $0x1], 1 }
 0x74b   :  { %1114 = vsyncpa [#allocation6], 1 }
 0x74c   :  { %1115 = vsyncpa [#allocation4], 1 }
 0x74d   :  { %1117 = vsyncpa [#allocation4 + $0x1], 1 }

</bundles_post_ra>
